<compile_context>
chip_gen: v7x
topology: tpu7x:2x2x1
jax: 0.10.0
libtpu: 0.0.40
codegen_flags: <defaults>
</compile_context>

<pallas_src>
import functools

import jax
import jax.numpy as jnp
from jax import lax
from jax.experimental import pallas as pl
from jax.experimental.pallas import tpu as pltpu


def _leaky(v):
    return jnp.where(v >= 0, v, 0.1 * v)


def _residual_unit_kernel(x_ref, w1_ref, w2_ref, bn1s_ref, bn1b_ref,
                          bn2s_ref, bn2b_ref, o_ref, *scratch,
                          H, W, Ho, Wo, Cin, Cout, stride, act_before,
                          row_blk):
    f32 = jnp.float32
    bf16 = jnp.bfloat16
    S = stride
    ext = 2 // S            # halo extent of the staged conv1 input (2 / 1)

    x_scr = scratch[0]      # bf16 staged conv1 input (zero-padded or s2d)
    h_scr = scratch[1]      # bf16 zero-padded conv1 output (conv2 input)
    r_scr = scratch[2] if len(scratch) > 2 else None   # f32 pooled residual

    def bn1_act(v):
        return _leaky(v * bn1s_ref[...] + bn1b_ref[...])

    # ------------- stage conv1 input (bf16, zero halo folded in) -------------
    if S == 1:
        x = x_ref[...]                                       # (H, W, Cin) f32
        xa = bn1_act(x) if act_before else x
        xa_b = xa.astype(bf16)
        zrow = jnp.zeros((1, W + 2, Cin), bf16)
        zcol = jnp.zeros((H, 1, Cin), bf16)
        x_scr[0:1, :, :] = zrow
        x_scr[H + 1:H + 2, :, :] = zrow
        x_scr[1:H + 1, :, :] = jnp.concatenate([zcol, xa_b, zcol], axis=1)
    else:
        # Space-to-depth staging: x_scr[R, C, (i*2+j)*Cin:...] = x_pad[2R+i, 2C+j]
        # so every stride-2 conv tap becomes a dense slice.  The four stride
        # phases are read once, activated in f32, and reused for the avg-pool
        # shortcut.
        def read_phase(i, j):
            v = x_ref[pl.ds(i, Ho, S), pl.ds(j, Wo, S), :]   # (Ho, Wo, Cin) f32
            return bn1_act(v) if act_before else v

        p00 = read_phase(0, 0)
        p01 = read_phase(0, 1)
        p10 = read_phase(1, 0)
        p11 = read_phase(1, 1)

        if r_scr is not None:
            # avg_pool2d(x, 2) of the (optionally activated) input, in f32.
            r_scr[...] = (p00 + p01 + p10 + p11) * 0.25

        def place(v, top, left):
            zc = jnp.zeros((Ho, 1, Cin), bf16)
            v = jnp.concatenate([zc, v] if left else [v, zc], axis=1)
            zr = jnp.zeros((1, Wo + 1, Cin), bf16)
            return jnp.concatenate([zr, v] if top else [v, zr], axis=0)

        x_scr[...] = jnp.concatenate(
            [place(p11.astype(bf16), True, True),     # x_pad phase (0, 0)
             place(p10.astype(bf16), True, False),    # x_pad phase (0, 1)
             place(p01.astype(bf16), False, True),    # x_pad phase (1, 0)
             place(p00.astype(bf16), False, False)],  # x_pad phase (1, 1)
            axis=-1)

    # Zero halo rows of the conv2-input scratch (columns are folded into the
    # dense interior stores below).  Interior rows are fully overwritten every
    # grid step, so this stays correct under "parallel" megacore sharding.
    zrow2 = jnp.zeros((1, Wo + 2, Cout), bf16)
    h_scr[0:1, :, :] = zrow2
    h_scr[Ho + 1:Ho + 2, :, :] = zrow2

    n_full = Ho // row_blk
    rem = Ho - n_full * row_blk

    def for_each_block(block_fn):
        if n_full <= 4:
            for rb in range(n_full):               # tiny trip count: unroll
                block_fn(rb * row_blk, row_blk)
        else:
            def body(rb, carry):
                block_fn(pl.multiple_of(rb * row_blk, row_blk), row_blk)
                return carry
            lax.fori_loop(0, n_full, body, 0)
        if rem:
            block_fn(n_full * row_blk, rem)

    # ------------- conv1: one fused-K (9*Cin) matmul per row block -----------
    def conv1_block(r0, th):
        band = x_scr[pl.ds(r0, th + ext), :, :]             # dense bf16 read
        taps = []
        for kh in range(3):
            for kw in range(3):
                ph = (kh % S) * S + (kw % S)
                taps.append(band[kh // S:kh // S + th,
                                 kw // S:kw // S + Wo,
                                 ph * Cin:(ph + 1) * Cin])
        patch = jnp.concatenate(taps, axis=-1).reshape(th * Wo, 9 * Cin)
        acc = jnp.dot(patch, w1_ref[...], preferred_element_type=f32)
        hblk = _leaky(acc * bn2s_ref[...] + bn2b_ref[...])  # bn2 + leaky, f32
        hb = hblk.astype(bf16).reshape(th, Wo, Cout)
        zc = jnp.zeros((th, 1, Cout), bf16)
        h_scr[pl.ds(1 + r0, th), :, :] = jnp.concatenate([zc, hb, zc], axis=1)

    for_each_block(conv1_block)

    # -------- conv2: fused-K (9*Cout) matmul + f32 residual add + store ------
    pad_c = (Cout - Cin) // 2

    def conv2_block(r0, th):
        band = h_scr[pl.ds(r0, th + 2), :, :]
        taps = []
        for kh in range(3):
            for kw in range(3):
                taps.append(band[kh:kh + th, kw:kw + Wo, :])
        patch = jnp.concatenate(taps, axis=-1).reshape(th * Wo, 9 * Cout)
        acc = jnp.dot(patch, w2_ref[...],
                      preferred_element_type=f32).reshape(th, Wo, Cout)

        # Residual branch, kept in f32.
        if Cin == Cout:                                     # identity, stride 1
            xr = x_ref[pl.ds(r0, th), :, :]
            res = bn1_act(xr) if act_before else xr
        else:
            if S == 1:
                xr = x_ref[pl.ds(r0, th), :, :]             # (th, Wo, Cin) f32
                pooled = bn1_act(xr) if act_before else xr
            else:
                pooled = r_scr[pl.ds(r0, th), :, :]         # precomputed pool
            res = jnp.concatenate(
                [jnp.zeros((th, Wo, pad_c), f32), pooled,
                 jnp.zeros((th, Wo, Cout - Cin - pad_c), f32)], axis=-1)

        o_ref[pl.ds(r0, th), :, :] = (acc + res).astype(o_ref.dtype)

    for_each_block(conv2_block)


def _mxu_row_target():
    # v6e/v7x MXUs are 256-wide; older parts prefer ~128 matmul rows per dot.
    try:
        kind = jax.devices()[0].device_kind.lower()
        if any(t in kind for t in ("v2", "v3", "v4", "v5")):
            return 128
    except Exception:
        pass
    return 256


def _prod(shape):
    out = 1
    for s in shape:
        out *= int(s)
    return out


def residual_unit_forward(x, params, *, stride=1, activate_before_residual=False):
    """x: (N, H, W, Cin) float32 in NHWC layout."""
    N, H, W, Cin = x.shape
    w1 = params["conv1_w"]            # (3, 3, Cin, Cout)  HWIO
    w2 = params["conv2_w"]            # (3, 3, Cout, Cout) HWIO
    Cout = w1.shape[-1]

    if stride not in (1, 2):
        raise ValueError("only stride 1 or 2 is supported.")
    if Cin == Cout and stride != 1:
        raise ValueError("Cin == Cout with stride > 1 is not supported "
                         "(the PyTorch module would fail the residual add).")
    if Cin != Cout:
        if Cout < Cin or (Cout - Cin) % 2 != 0:
            raise ValueError("channel-pad shortcut requires Cout >= Cin and "
                             "(Cout - Cin) even.")
        if stride > 1 and (H % stride != 0 or W % stride != 0):
            raise ValueError("avg_pool shortcut requires H, W divisible by stride.")

    Ho = (H + 2 - 3) // stride + 1
    Wo = (W + 2 - 3) // stride + 1
    eps = 1e-5

    bn1_scale = params["bn1_gamma"] / jnp.sqrt(params["bn1_var"] + eps)
    bn1_shift = params["bn1_beta"] - params["bn1_mean"] * bn1_scale
    bn2_scale = params["bn2_gamma"] / jnp.sqrt(params["bn2_var"] + eps)
    bn2_shift = params["bn2_beta"] - params["bn2_mean"] * bn2_scale

    # One (th*Wo, 9*C) x (9*C, Cout) MXU matmul per output row-block.
    row_blk = max(1, min(Ho, max(1, _mxu_row_target() // max(1, Wo))))

    if stride == 1:
        x_scr_shape = (H + 2, W + 2, Cin)          # zero-padded image
    else:
        x_scr_shape = (Ho + 1, Wo + 1, 4 * Cin)    # space-to-depth phases

    scratch_shapes = [
        pltpu.VMEM(x_scr_shape, jnp.bfloat16),
        pltpu.VMEM((Ho + 2, Wo + 2, Cout), jnp.bfloat16),
    ]
    if stride > 1:
        scratch_shapes.append(pltpu.VMEM((Ho, Wo, Cin), jnp.float32))

    # VMEM budget (v7x has only 64 MiB physical; the scoped default is lower).
    est = (2 * H * W * Cin * 4                      # input block, 2x buffered
           + 2 * Ho * Wo * Cout * 4                 # output block, 2x buffered
           + 2 * 9 * (Cin + Cout) * Cout * 2        # bf16 weights, 2x buffered
           + _prod(x_scr_shape) * 2
           + (Ho + 2) * (Wo + 2) * Cout * 2
           + (Ho * Wo * Cin * 4 if stride > 1 else 0)
           + row_blk * Wo * (9 * max(Cin, Cout) * 2 + 4 * Cout * 4))
    vmem_limit = int(min(64 * 2 ** 20, max(16 * 2 ** 20, 3 * est)))

    kernel = functools.partial(
        _residual_unit_kernel, H=H, W=W, Ho=Ho, Wo=Wo, Cin=Cin, Cout=Cout,
        stride=stride, act_before=activate_before_residual, row_blk=row_blk)

    out = pl.pallas_call(
        kernel,
        out_shape=jax.ShapeDtypeStruct((N, Ho, Wo, Cout), jnp.float32),
        grid_spec=pltpu.PrefetchScalarGridSpec(
            num_scalar_prefetch=0,
            grid=(N,),
            in_specs=[
                pl.BlockSpec((None, H, W, Cin), lambda n: (n, 0, 0, 0)),
                pl.BlockSpec((9 * Cin, Cout), lambda n: (0, 0)),
                pl.BlockSpec((9 * Cout, Cout), lambda n: (0, 0)),
                pl.BlockSpec((1, Cin), lambda n: (0, 0)),
                pl.BlockSpec((1, Cin), lambda n: (0, 0)),
                pl.BlockSpec((1, Cout), lambda n: (0, 0)),
                pl.BlockSpec((1, Cout), lambda n: (0, 0)),
            ],
            out_specs=pl.BlockSpec((None, Ho, Wo, Cout), lambda n: (n, 0, 0, 0)),
            scratch_shapes=scratch_shapes,
        ),
        compiler_params=pltpu.CompilerParams(
            dimension_semantics=("parallel",),       # batch items independent
            vmem_limit_bytes=vmem_limit),
    )(x,
      w1.reshape(9 * Cin, Cout).astype(jnp.bfloat16),
      w2.reshape(9 * Cout, Cout).astype(jnp.bfloat16),
      bn1_scale.reshape(1, Cin), bn1_shift.reshape(1, Cin),
      bn2_scale.reshape(1, Cout), bn2_shift.reshape(1, Cout))
    return out


def residual_unit_reference(x, params, *, stride=1, activate_before_residual=False):
    """Pure-JAX reference (eval-mode BN folding, bf16 MXU operands), NHWC."""
    Cin = x.shape[-1]
    w1 = params["conv1_w"]
    w2 = params["conv2_w"]
    Cout = w1.shape[-1]
    eps = 1e-5
    bn1_scale = params["bn1_gamma"] / jnp.sqrt(params["bn1_var"] + eps)
    bn1_shift = params["bn1_beta"] - params["bn1_mean"] * bn1_scale
    bn2_scale = params["bn2_gamma"] / jnp.sqrt(params["bn2_var"] + eps)
    bn2_shift = params["bn2_beta"] - params["bn2_mean"] * bn2_scale

    dn = ("NHWC", "HWIO", "NHWC")

    def conv(v, w, s):
        return lax.conv_general_dilated(
            v.astype(jnp.bfloat16), w.astype(jnp.bfloat16), (s, s),
            ((1, 1), (1, 1)), dimension_numbers=dn,
            preferred_element_type=jnp.float32)

    if activate_before_residual:
        x = _leaky(x * bn1_scale.reshape(1, 1, 1, Cin) + bn1_shift.reshape(1, 1, 1, Cin))
    h = conv(x, w1, stride)
    h = _leaky(h * bn2_scale.reshape(1, 1, 1, Cout) + bn2_shift.reshape(1, 1, 1, Cout))
    out = conv(h, w2, 1)
    res = x
    if Cin != Cout:
        if stride > 1:
            res = lax.reduce_window(res, 0.0, lax.add,
                                    (1, stride, stride, 1), (1, stride, stride, 1),
                                    "VALID") / float(stride * stride)
        pc = (Cout - Cin) // 2
        res = jnp.pad(res, ((0, 0), (0, 0), (0, 0), (pc, Cout - Cin - pc)))
    return out + res


def make_params(key, cin, cout):
    ks = jax.random.split(key, 10)
    return {
        "conv1_w": 0.1 * jax.random.normal(ks[0], (3, 3, cin, cout), jnp.float32),
        "conv2_w": 0.1 * jax.random.normal(ks[1], (3, 3, cout, cout), jnp.float32),
        "bn1_gamma": 1.0 + 0.1 * jax.random.normal(ks[2], (cin,), jnp.float32),
        "bn1_beta": 0.1 * jax.random.normal(ks[3], (cin,), jnp.float32),
        "bn1_mean": 0.1 * jax.random.normal(ks[4], (cin,), jnp.float32),
        "bn1_var": jax.random.uniform(ks[5], (cin,), jnp.float32, 0.5, 1.5),
        "bn2_gamma": 1.0 + 0.1 * jax.random.normal(ks[6], (cout,), jnp.float32),
        "bn2_beta": 0.1 * jax.random.normal(ks[7], (cout,), jnp.float32),
        "bn2_mean": 0.1 * jax.random.normal(ks[8], (cout,), jnp.float32),
        "bn2_var": jax.random.uniform(ks[9], (cout,), jnp.float32, 0.5, 1.5),
    }


if __name__ == "__main__":
    key = jax.random.PRNGKey(0)
    kx1, kx2, kx3, kp1, kp2, kp3 = jax.random.split(key, 6)

    # Case 1: channel expansion (4 -> 8), stride 2, activate_before_residual=True.
    x1 = jax.random.normal(kx1, (2, 16, 16, 4), jnp.float32)
    p1 = make_params(kp1, 4, 8)
    out1 = jax.block_until_ready(
        residual_unit_forward(x1, p1, stride=2, activate_before_residual=True))
    ref1 = residual_unit_reference(x1, p1, stride=2, activate_before_residual=True)
    assert out1.shape == (2, 8, 8, 8)
    assert bool(jnp.allclose(out1, ref1, atol=1e-2, rtol=1e-2)), (
        float(jnp.max(jnp.abs(out1 - ref1))))

    # Case 2: identity shortcut (8 -> 8), stride 1, activate_before_residual=False.
    x2 = jax.random.normal(kx2, (2, 16, 16, 8), jnp.float32)
    p2 = make_params(kp2, 8, 8)
    out2 = jax.block_until_ready(
        residual_unit_forward(x2, p2, stride=1, activate_before_residual=False))
    ref2 = residual_unit_reference(x2, p2, stride=1, activate_before_residual=False)
    assert out2.shape == (2, 16, 16, 8)
    assert bool(jnp.allclose(out2, ref2, atol=1e-2, rtol=1e-2)), (
        float(jnp.max(jnp.abs(out2 - ref2))))

    # Case 3: channel expansion (4 -> 8), stride 1, activate_before_residual=False.
    x3 = jax.random.normal(kx3, (2, 16, 16, 4), jnp.float32)
    p3 = make_params(kp3, 4, 8)
    out3 = jax.block_until_ready(
        residual_unit_forward(x3, p3, stride=1, activate_before_residual=False))
    ref3 = residual_unit_reference(x3, p3, stride=1, activate_before_residual=False)
    assert out3.shape == (2, 16, 16, 8)
    assert bool(jnp.allclose(out3, ref3, atol=1e-2, rtol=1e-2)), (
        float(jnp.max(jnp.abs(out3 - ref3))))

    print("KERNEL_OK")
</pallas_src>

<mosaic_0001>
module attributes {stable_mosaic.version = 11 : i64} {
  func.func @_residual_unit_kernel(%arg0: i32, %arg1: memref<1x16x16x4xf32, #tpu.memory_space<vmem>>, %arg2: memref<36x8xbf16, #tpu.memory_space<vmem>>, %arg3: memref<72x8xbf16, #tpu.memory_space<vmem>>, %arg4: memref<1x4xf32, #tpu.memory_space<vmem>>, %arg5: memref<1x4xf32, #tpu.memory_space<vmem>>, %arg6: memref<1x8xf32, #tpu.memory_space<vmem>>, %arg7: memref<1x8xf32, #tpu.memory_space<vmem>>, %arg8: memref<1x8x8x8xf32, #tpu.memory_space<vmem>>, %arg9: memref<9x9x16xbf16, #tpu.memory_space<vmem>>, %arg10: memref<10x10x8xbf16, #tpu.memory_space<vmem>>, %arg11: memref<8x8x4xf32, #tpu.memory_space<vmem>>) attributes {dimension_semantics = [#tpu.dimension_semantics<parallel>], iteration_bounds = array<i64: 2>, scalar_prefetch = 0 : i64, scratch_operands = 3 : i64, tpu.core_type = #tpu.core_type<tc>, window_params = [{transform_indices = @transform_0, window_bounds = array<i64: 1, 16, 16, 4>}, {pipeline_mode = #tpu.pipeline_mode<synchronous>, transform_indices = @transform_1, window_bounds = array<i64: 36, 8>}, {pipeline_mode = #tpu.pipeline_mode<synchronous>, transform_indices = @transform_2, window_bounds = array<i64: 72, 8>}, {pipeline_mode = #tpu.pipeline_mode<synchronous>, transform_indices = @transform_3, window_bounds = array<i64: 1, 4>}, {pipeline_mode = #tpu.pipeline_mode<synchronous>, transform_indices = @transform_4, window_bounds = array<i64: 1, 4>}, {pipeline_mode = #tpu.pipeline_mode<synchronous>, transform_indices = @transform_5, window_bounds = array<i64: 1, 8>}, {pipeline_mode = #tpu.pipeline_mode<synchronous>, transform_indices = @transform_6, window_bounds = array<i64: 1, 8>}, {transform_indices = @transform_7, window_bounds = array<i64: 1, 8, 8, 8>}]} {
    %c0 = arith.constant 0 : index
    %c0_0 = arith.constant 0 : index
    %c0_1 = arith.constant 0 : index
    %c0_2 = arith.constant 0 : index
    %0 = tpu.strided_load %arg1[%c0, %c0_0, %c0_1, %c0_2] {strides = array<i32: 1, 2, 2, 1>} : memref<1x16x16x4xf32, #tpu.memory_space<vmem>>, vector<1x8x8x4xf32>
    %1 = vector.shape_cast %0 : vector<1x8x8x4xf32> to vector<8x8x4xf32>
    %c0_3 = arith.constant 0 : index
    %c0_4 = arith.constant 0 : index
    %2 = vector.load %arg4[%c0_3, %c0_4] : memref<1x4xf32, #tpu.memory_space<vmem>>, vector<1x4xf32>
    %3 = vector.shape_cast %2 : vector<1x4xf32> to vector<1x1x4xf32>
    %4 = vector.broadcast %3 : vector<1x1x4xf32> to vector<8x8x4xf32>
    %5 = arith.mulf %1, %4 : vector<8x8x4xf32>
    %c0_5 = arith.constant 0 : index
    %c0_6 = arith.constant 0 : index
    %6 = vector.load %arg5[%c0_5, %c0_6] : memref<1x4xf32, #tpu.memory_space<vmem>>, vector<1x4xf32>
    %7 = vector.shape_cast %6 : vector<1x4xf32> to vector<1x1x4xf32>
    %8 = vector.broadcast %7 : vector<1x1x4xf32> to vector<8x8x4xf32>
    %9 = arith.addf %5, %8 : vector<8x8x4xf32>
    %cst = arith.constant 0.000000e+00 : f32
    %10 = vector.broadcast %cst : f32 to vector<8x8x4xf32>
    %11 = arith.cmpf oge, %9, %10 : vector<8x8x4xf32>
    %cst_7 = arith.constant 1.000000e-01 : f32
    %12 = vector.broadcast %cst_7 : f32 to vector<8x8x4xf32>
    %13 = arith.mulf %12, %9 : vector<8x8x4xf32>
    %14 = arith.select %11, %9, %13 : vector<8x8x4xi1>, vector<8x8x4xf32>
    %c0_8 = arith.constant 0 : index
    %c0_9 = arith.constant 0 : index
    %c1 = arith.constant 1 : index
    %c0_10 = arith.constant 0 : index
    %15 = tpu.strided_load %arg1[%c0_8, %c0_9, %c1, %c0_10] {strides = array<i32: 1, 2, 2, 1>} : memref<1x16x16x4xf32, #tpu.memory_space<vmem>>, vector<1x8x8x4xf32>
    %16 = vector.shape_cast %15 : vector<1x8x8x4xf32> to vector<8x8x4xf32>
    %c0_11 = arith.constant 0 : index
    %c0_12 = arith.constant 0 : index
    %17 = vector.load %arg4[%c0_11, %c0_12] : memref<1x4xf32, #tpu.memory_space<vmem>>, vector<1x4xf32>
    %18 = vector.shape_cast %17 : vector<1x4xf32> to vector<1x1x4xf32>
    %19 = vector.broadcast %18 : vector<1x1x4xf32> to vector<8x8x4xf32>
    %20 = arith.mulf %16, %19 : vector<8x8x4xf32>
    %c0_13 = arith.constant 0 : index
    %c0_14 = arith.constant 0 : index
    %21 = vector.load %arg5[%c0_13, %c0_14] : memref<1x4xf32, #tpu.memory_space<vmem>>, vector<1x4xf32>
    %22 = vector.shape_cast %21 : vector<1x4xf32> to vector<1x1x4xf32>
    %23 = vector.broadcast %22 : vector<1x1x4xf32> to vector<8x8x4xf32>
    %24 = arith.addf %20, %23 : vector<8x8x4xf32>
    %cst_15 = arith.constant 0.000000e+00 : f32
    %25 = vector.broadcast %cst_15 : f32 to vector<8x8x4xf32>
    %26 = arith.cmpf oge, %24, %25 : vector<8x8x4xf32>
    %cst_16 = arith.constant 1.000000e-01 : f32
    %27 = vector.broadcast %cst_16 : f32 to vector<8x8x4xf32>
    %28 = arith.mulf %27, %24 : vector<8x8x4xf32>
    %29 = arith.select %26, %24, %28 : vector<8x8x4xi1>, vector<8x8x4xf32>
    %c0_17 = arith.constant 0 : index
    %c1_18 = arith.constant 1 : index
    %c0_19 = arith.constant 0 : index
    %c0_20 = arith.constant 0 : index
    %30 = tpu.strided_load %arg1[%c0_17, %c1_18, %c0_19, %c0_20] {strides = array<i32: 1, 2, 2, 1>} : memref<1x16x16x4xf32, #tpu.memory_space<vmem>>, vector<1x8x8x4xf32>
    %31 = vector.shape_cast %30 : vector<1x8x8x4xf32> to vector<8x8x4xf32>
    %c0_21 = arith.constant 0 : index
    %c0_22 = arith.constant 0 : index
    %32 = vector.load %arg4[%c0_21, %c0_22] : memref<1x4xf32, #tpu.memory_space<vmem>>, vector<1x4xf32>
    %33 = vector.shape_cast %32 : vector<1x4xf32> to vector<1x1x4xf32>
    %34 = vector.broadcast %33 : vector<1x1x4xf32> to vector<8x8x4xf32>
    %35 = arith.mulf %31, %34 : vector<8x8x4xf32>
    %c0_23 = arith.constant 0 : index
    %c0_24 = arith.constant 0 : index
    %36 = vector.load %arg5[%c0_23, %c0_24] : memref<1x4xf32, #tpu.memory_space<vmem>>, vector<1x4xf32>
    %37 = vector.shape_cast %36 : vector<1x4xf32> to vector<1x1x4xf32>
    %38 = vector.broadcast %37 : vector<1x1x4xf32> to vector<8x8x4xf32>
    %39 = arith.addf %35, %38 : vector<8x8x4xf32>
    %cst_25 = arith.constant 0.000000e+00 : f32
    %40 = vector.broadcast %cst_25 : f32 to vector<8x8x4xf32>
    %41 = arith.cmpf oge, %39, %40 : vector<8x8x4xf32>
    %cst_26 = arith.constant 1.000000e-01 : f32
    %42 = vector.broadcast %cst_26 : f32 to vector<8x8x4xf32>
    %43 = arith.mulf %42, %39 : vector<8x8x4xf32>
    %44 = arith.select %41, %39, %43 : vector<8x8x4xi1>, vector<8x8x4xf32>
    %c0_27 = arith.constant 0 : index
    %c1_28 = arith.constant 1 : index
    %c1_29 = arith.constant 1 : index
    %c0_30 = arith.constant 0 : index
    %45 = tpu.strided_load %arg1[%c0_27, %c1_28, %c1_29, %c0_30] {strides = array<i32: 1, 2, 2, 1>} : memref<1x16x16x4xf32, #tpu.memory_space<vmem>>, vector<1x8x8x4xf32>
    %46 = vector.shape_cast %45 : vector<1x8x8x4xf32> to vector<8x8x4xf32>
    %c0_31 = arith.constant 0 : index
    %c0_32 = arith.constant 0 : index
    %47 = vector.load %arg4[%c0_31, %c0_32] : memref<1x4xf32, #tpu.memory_space<vmem>>, vector<1x4xf32>
    %48 = vector.shape_cast %47 : vector<1x4xf32> to vector<1x1x4xf32>
    %49 = vector.broadcast %48 : vector<1x1x4xf32> to vector<8x8x4xf32>
    %50 = arith.mulf %46, %49 : vector<8x8x4xf32>
    %c0_33 = arith.constant 0 : index
    %c0_34 = arith.constant 0 : index
    %51 = vector.load %arg5[%c0_33, %c0_34] : memref<1x4xf32, #tpu.memory_space<vmem>>, vector<1x4xf32>
    %52 = vector.shape_cast %51 : vector<1x4xf32> to vector<1x1x4xf32>
    %53 = vector.broadcast %52 : vector<1x1x4xf32> to vector<8x8x4xf32>
    %54 = arith.addf %50, %53 : vector<8x8x4xf32>
    %cst_35 = arith.constant 0.000000e+00 : f32
    %55 = vector.broadcast %cst_35 : f32 to vector<8x8x4xf32>
    %56 = arith.cmpf oge, %54, %55 : vector<8x8x4xf32>
    %cst_36 = arith.constant 1.000000e-01 : f32
    %57 = vector.broadcast %cst_36 : f32 to vector<8x8x4xf32>
    %58 = arith.mulf %57, %54 : vector<8x8x4xf32>
    %59 = arith.select %56, %54, %58 : vector<8x8x4xi1>, vector<8x8x4xf32>
    %60 = arith.addf %14, %29 : vector<8x8x4xf32>
    %61 = arith.addf %60, %44 : vector<8x8x4xf32>
    %62 = arith.addf %61, %59 : vector<8x8x4xf32>
    %cst_37 = arith.constant 2.500000e-01 : f32
    %63 = vector.broadcast %cst_37 : f32 to vector<8x8x4xf32>
    %64 = arith.mulf %62, %63 : vector<8x8x4xf32>
    %c0_38 = arith.constant 0 : index
    %c0_39 = arith.constant 0 : index
    %c0_40 = arith.constant 0 : index
    %65 = vector.load %arg11[%c0_38, %c0_39, %c0_40] : memref<8x8x4xf32, #tpu.memory_space<vmem>>, vector<8x8x4xf32>
    tpu.vector_store %arg11[%c0_38, %c0_39, %c0_40], %64 {strides = array<i32>} : memref<8x8x4xf32, #tpu.memory_space<vmem>>, vector<8x8x4xf32>,
    %66 = arith.truncf %59 : vector<8x8x4xf32> to vector<8x8x4xbf16>
    %cst_41 = arith.constant 0.000000e+00 : bf16
    %67 = vector.broadcast %cst_41 : bf16 to vector<8x1x4xbf16>
    %68 = tpu.concatenate %67, %66 in 1 : vector<8x1x4xbf16>, vector<8x8x4xbf16> -> vector<8x9x4xbf16>
    %cst_42 = arith.constant 0.000000e+00 : bf16
    %69 = vector.broadcast %cst_42 : bf16 to vector<1x9x4xbf16>
    %70 = tpu.concatenate %69, %68 in 0 : vector<1x9x4xbf16>, vector<8x9x4xbf16> -> vector<9x9x4xbf16>
    %71 = arith.truncf %44 : vector<8x8x4xf32> to vector<8x8x4xbf16>
    %cst_43 = arith.constant 0.000000e+00 : bf16
    %72 = vector.broadcast %cst_43 : bf16 to vector<8x1x4xbf16>
    %73 = tpu.concatenate %71, %72 in 1 : vector<8x8x4xbf16>, vector<8x1x4xbf16> -> vector<8x9x4xbf16>
    %cst_44 = arith.constant 0.000000e+00 : bf16
    %74 = vector.broadcast %cst_44 : bf16 to vector<1x9x4xbf16>
    %75 = tpu.concatenate %74, %73 in 0 : vector<1x9x4xbf16>, vector<8x9x4xbf16> -> vector<9x9x4xbf16>
    %76 = arith.truncf %29 : vector<8x8x4xf32> to vector<8x8x4xbf16>
    %cst_45 = arith.constant 0.000000e+00 : bf16
    %77 = vector.broadcast %cst_45 : bf16 to vector<8x1x4xbf16>
    %78 = tpu.concatenate %77, %76 in 1 : vector<8x1x4xbf16>, vector<8x8x4xbf16> -> vector<8x9x4xbf16>
    %cst_46 = arith.constant 0.000000e+00 : bf16
    %79 = vector.broadcast %cst_46 : bf16 to vector<1x9x4xbf16>
    %80 = tpu.concatenate %78, %79 in 0 : vector<8x9x4xbf16>, vector<1x9x4xbf16> -> vector<9x9x4xbf16>
    %81 = arith.truncf %14 : vector<8x8x4xf32> to vector<8x8x4xbf16>
    %cst_47 = arith.constant 0.000000e+00 : bf16
    %82 = vector.broadcast %cst_47 : bf16 to vector<8x1x4xbf16>
    %83 = tpu.concatenate %81, %82 in 1 : vector<8x8x4xbf16>, vector<8x1x4xbf16> -> vector<8x9x4xbf16>
    %cst_48 = arith.constant 0.000000e+00 : bf16
    %84 = vector.broadcast %cst_48 : bf16 to vector<1x9x4xbf16>
    %85 = tpu.concatenate %83, %84 in 0 : vector<8x9x4xbf16>, vector<1x9x4xbf16> -> vector<9x9x4xbf16>
    %86 = tpu.concatenate %70, %75, %80, %85 in 2 : vector<9x9x4xbf16>, vector<9x9x4xbf16>, vector<9x9x4xbf16>, vector<9x9x4xbf16> -> vector<9x9x16xbf16>
    %c0_49 = arith.constant 0 : index
    %c0_50 = arith.constant 0 : index
    %c0_51 = arith.constant 0 : index
    %87 = vector.load %arg9[%c0_49, %c0_50, %c0_51] : memref<9x9x16xbf16, #tpu.memory_space<vmem>>, vector<9x9x16xbf16>
    tpu.vector_store %arg9[%c0_49, %c0_50, %c0_51], %86 {strides = array<i32>} : memref<9x9x16xbf16, #tpu.memory_space<vmem>>, vector<9x9x16xbf16>,
    %cst_52 = arith.constant 0.000000e+00 : bf16
    %88 = vector.broadcast %cst_52 : bf16 to vector<1x10x8xbf16>
    %c0_53 = arith.constant 0 : index
    %c0_54 = arith.constant 0 : index
    %c0_55 = arith.constant 0 : index
    %89 = vector.load %arg10[%c0_53, %c0_54, %c0_55] : memref<10x10x8xbf16, #tpu.memory_space<vmem>>, vector<1x10x8xbf16>
    tpu.vector_store %arg10[%c0_53, %c0_54, %c0_55], %88 {strides = array<i32>} : memref<10x10x8xbf16, #tpu.memory_space<vmem>>, vector<1x10x8xbf16>,
    %c9 = arith.constant 9 : index
    %c0_56 = arith.constant 0 : index
    %c0_57 = arith.constant 0 : index
    %90 = vector.load %arg10[%c9, %c0_56, %c0_57] : memref<10x10x8xbf16, #tpu.memory_space<vmem>>, vector<1x10x8xbf16>
    tpu.vector_store %arg10[%c9, %c0_56, %c0_57], %88 {strides = array<i32>} : memref<10x10x8xbf16, #tpu.memory_space<vmem>>, vector<1x10x8xbf16>,
    %c0_58 = arith.constant 0 : index
    %c0_59 = arith.constant 0 : index
    %c0_60 = arith.constant 0 : index
    %91 = vector.load %arg9[%c0_58, %c0_59, %c0_60] : memref<9x9x16xbf16, #tpu.memory_space<vmem>>, vector<9x9x16xbf16>
    %92 = vector.extract_strided_slice %91 {offsets = [0, 0, 0], sizes = [8, 8, 4], strides = [1, 1, 1]} : vector<9x9x16xbf16> to vector<8x8x4xbf16>
    %93 = vector.extract_strided_slice %91 {offsets = [0, 0, 4], sizes = [8, 8, 4], strides = [1, 1, 1]} : vector<9x9x16xbf16> to vector<8x8x4xbf16>
    %94 = vector.extract_strided_slice %91 {offsets = [0, 1, 0], sizes = [8, 8, 4], strides = [1, 1, 1]} : vector<9x9x16xbf16> to vector<8x8x4xbf16>
    %95 = vector.extract_strided_slice %91 {offsets = [0, 0, 8], sizes = [8, 8, 4], strides = [1, 1, 1]} : vector<9x9x16xbf16> to vector<8x8x4xbf16>
    %96 = vector.extract_strided_slice %91 {offsets = [0, 0, 12], sizes = [8, 8, 4], strides = [1, 1, 1]} : vector<9x9x16xbf16> to vector<8x8x4xbf16>
    %97 = vector.extract_strided_slice %91 {offsets = [0, 1, 8], sizes = [8, 8, 4], strides = [1, 1, 1]} : vector<9x9x16xbf16> to vector<8x8x4xbf16>
    %98 = vector.extract_strided_slice %91 {offsets = [1, 0, 0], sizes = [8, 8, 4], strides = [1, 1, 1]} : vector<9x9x16xbf16> to vector<8x8x4xbf16>
    %99 = vector.extract_strided_slice %91 {offsets = [1, 0, 4], sizes = [8, 8, 4], strides = [1, 1, 1]} : vector<9x9x16xbf16> to vector<8x8x4xbf16>
    %100 = vector.extract_strided_slice %91 {offsets = [1, 1, 0], sizes = [8, 8, 4], strides = [1, 1, 1]} : vector<9x9x16xbf16> to vector<8x8x4xbf16>
    %101 = tpu.concatenate %92, %93, %94, %95, %96, %97, %98, %99, %100 in 2 : vector<8x8x4xbf16>, vector<8x8x4xbf16>, vector<8x8x4xbf16>, vector<8x8x4xbf16>, vector<8x8x4xbf16>, vector<8x8x4xbf16>, vector<8x8x4xbf16>, vector<8x8x4xbf16>, vector<8x8x4xbf16> -> vector<8x8x36xbf16>
    %102 = vector.shape_cast %101 : vector<8x8x36xbf16> to vector<64x36xbf16>
    %c0_61 = arith.constant 0 : index
    %c0_62 = arith.constant 0 : index
    %103 = vector.load %arg2[%c0_61, %c0_62] : memref<36x8xbf16, #tpu.memory_space<vmem>>, vector<36x8xbf16>
    %cst_63 = arith.constant dense<0.000000e+00> : vector<64x8xf32>
    %104 = tpu.matmul %102, %103, %cst_63 {dimension_numbers = #tpu.dot_dimension_numbers<[1], [0], [0], [1], [0, 0, 1, 1], [], []>} : vector<64x36xbf16>, vector<36x8xbf16>, vector<64x8xf32> -> vector<64x8xf32>
    %c0_64 = arith.constant 0 : index
    %c0_65 = arith.constant 0 : index
    %105 = vector.load %arg6[%c0_64, %c0_65] : memref<1x8xf32, #tpu.memory_space<vmem>>, vector<1x8xf32>
    %106 = vector.broadcast %105 : vector<1x8xf32> to vector<64x8xf32>
    %107 = arith.mulf %104, %106 : vector<64x8xf32>
    %c0_66 = arith.constant 0 : index
    %c0_67 = arith.constant 0 : index
    %108 = vector.load %arg7[%c0_66, %c0_67] : memref<1x8xf32, #tpu.memory_space<vmem>>, vector<1x8xf32>
    %109 = vector.broadcast %108 : vector<1x8xf32> to vector<64x8xf32>
    %110 = arith.addf %107, %109 : vector<64x8xf32>
    %cst_68 = arith.constant 0.000000e+00 : f32
    %111 = vector.broadcast %cst_68 : f32 to vector<64x8xf32>
    %112 = arith.cmpf oge, %110, %111 : vector<64x8xf32>
    %cst_69 = arith.constant 1.000000e-01 : f32
    %113 = vector.broadcast %cst_69 : f32 to vector<64x8xf32>
    %114 = arith.mulf %113, %110 : vector<64x8xf32>
    %115 = arith.select %112, %110, %114 : vector<64x8xi1>, vector<64x8xf32>
    %116 = arith.truncf %115 : vector<64x8xf32> to vector<64x8xbf16>
    %117 = vector.shape_cast %116 : vector<64x8xbf16> to vector<8x8x8xbf16>
    %cst_70 = arith.constant 0.000000e+00 : bf16
    %118 = vector.broadcast %cst_70 : bf16 to vector<8x1x8xbf16>
    %119 = tpu.concatenate %118, %117, %118 in 1 : vector<8x1x8xbf16>, vector<8x8x8xbf16>, vector<8x1x8xbf16> -> vector<8x10x8xbf16>
    %c1_71 = arith.constant 1 : index
    %c0_72 = arith.constant 0 : index
    %c0_73 = arith.constant 0 : index
    %120 = vector.load %arg10[%c1_71, %c0_72, %c0_73] : memref<10x10x8xbf16, #tpu.memory_space<vmem>>, vector<8x10x8xbf16>
    tpu.vector_store %arg10[%c1_71, %c0_72, %c0_73], %119 {strides = array<i32>} : memref<10x10x8xbf16, #tpu.memory_space<vmem>>, vector<8x10x8xbf16>,
    %c0_74 = arith.constant 0 : index
    %c0_75 = arith.constant 0 : index
    %c0_76 = arith.constant 0 : index
    %121 = vector.load %arg10[%c0_74, %c0_75, %c0_76] : memref<10x10x8xbf16, #tpu.memory_space<vmem>>, vector<10x10x8xbf16>
    %122 = vector.extract_strided_slice %121 {offsets = [0, 0, 0], sizes = [8, 8, 8], strides = [1, 1, 1]} : vector<10x10x8xbf16> to vector<8x8x8xbf16>
    %123 = vector.extract_strided_slice %121 {offsets = [0, 1, 0], sizes = [8, 8, 8], strides = [1, 1, 1]} : vector<10x10x8xbf16> to vector<8x8x8xbf16>
    %124 = vector.extract_strided_slice %121 {offsets = [0, 2, 0], sizes = [8, 8, 8], strides = [1, 1, 1]} : vector<10x10x8xbf16> to vector<8x8x8xbf16>
    %125 = vector.extract_strided_slice %121 {offsets = [1, 0, 0], sizes = [8, 8, 8], strides = [1, 1, 1]} : vector<10x10x8xbf16> to vector<8x8x8xbf16>
    %126 = vector.extract_strided_slice %121 {offsets = [1, 1, 0], sizes = [8, 8, 8], strides = [1, 1, 1]} : vector<10x10x8xbf16> to vector<8x8x8xbf16>
    %127 = vector.extract_strided_slice %121 {offsets = [1, 2, 0], sizes = [8, 8, 8], strides = [1, 1, 1]} : vector<10x10x8xbf16> to vector<8x8x8xbf16>
    %128 = vector.extract_strided_slice %121 {offsets = [2, 0, 0], sizes = [8, 8, 8], strides = [1, 1, 1]} : vector<10x10x8xbf16> to vector<8x8x8xbf16>
    %129 = vector.extract_strided_slice %121 {offsets = [2, 1, 0], sizes = [8, 8, 8], strides = [1, 1, 1]} : vector<10x10x8xbf16> to vector<8x8x8xbf16>
    %130 = vector.extract_strided_slice %121 {offsets = [2, 2, 0], sizes = [8, 8, 8], strides = [1, 1, 1]} : vector<10x10x8xbf16> to vector<8x8x8xbf16>
    %131 = tpu.concatenate %122, %123, %124, %125, %126, %127, %128, %129, %130 in 2 : vector<8x8x8xbf16>, vector<8x8x8xbf16>, vector<8x8x8xbf16>, vector<8x8x8xbf16>, vector<8x8x8xbf16>, vector<8x8x8xbf16>, vector<8x8x8xbf16>, vector<8x8x8xbf16>, vector<8x8x8xbf16> -> vector<8x8x72xbf16>
    %132 = vector.shape_cast %131 : vector<8x8x72xbf16> to vector<64x72xbf16>
    %c0_77 = arith.constant 0 : index
    %c0_78 = arith.constant 0 : index
    %133 = vector.load %arg3[%c0_77, %c0_78] : memref<72x8xbf16, #tpu.memory_space<vmem>>, vector<72x8xbf16>
    %cst_79 = arith.constant dense<0.000000e+00> : vector<64x8xf32>
    %134 = tpu.matmul %132, %133, %cst_79 {dimension_numbers = #tpu.dot_dimension_numbers<[1], [0], [0], [1], [0, 0, 1, 1], [], []>} : vector<64x72xbf16>, vector<72x8xbf16>, vector<64x8xf32> -> vector<64x8xf32>
    %135 = vector.shape_cast %134 : vector<64x8xf32> to vector<8x8x8xf32>
    %c0_80 = arith.constant 0 : index
    %c0_81 = arith.constant 0 : index
    %c0_82 = arith.constant 0 : index
    %136 = vector.load %arg11[%c0_80, %c0_81, %c0_82] : memref<8x8x4xf32, #tpu.memory_space<vmem>>, vector<8x8x4xf32>
    %cst_83 = arith.constant 0.000000e+00 : f32
    %137 = vector.broadcast %cst_83 : f32 to vector<8x8x2xf32>
    %cst_84 = arith.constant 0.000000e+00 : f32
    %138 = vector.broadcast %cst_84 : f32 to vector<8x8x2xf32>
    %139 = tpu.concatenate %137, %136, %138 in 2 : vector<8x8x2xf32>, vector<8x8x4xf32>, vector<8x8x2xf32> -> vector<8x8x8xf32>
    %140 = arith.addf %135, %139 : vector<8x8x8xf32>
    %c0_85 = arith.constant 0 : index
    %c0_86 = arith.constant 0 : index
    %c0_87 = arith.constant 0 : index
    %c0_88 = arith.constant 0 : index
    %141 = vector.load %arg8[%c0_85, %c0_86, %c0_87, %c0_88] : memref<1x8x8x8xf32, #tpu.memory_space<vmem>>, vector<1x8x8x8xf32>
    %142 = vector.shape_cast %141 : vector<1x8x8x8xf32> to vector<8x8x8xf32>
    %143 = vector.shape_cast %140 : vector<8x8x8xf32> to vector<1x8x8x8xf32>
    tpu.vector_store %arg8[%c0_85, %c0_86, %c0_87, %c0_88], %143 {strides = array<i32>} : memref<1x8x8x8xf32, #tpu.memory_space<vmem>>, vector<1x8x8x8xf32>,
    return
  }
  func.func @transform_0(%arg0: i32) -> (i32, i32, i32, i32) {
    %c0_i32 = arith.constant 0 : i32
    %c0_i32_0 = arith.constant 0 : i32
    %c0_i32_1 = arith.constant 0 : i32
    %c0_i32_2 = arith.constant 0 : i32
    return %arg0, %c0_i32, %c0_i32_0, %c0_i32_1 : i32, i32, i32, i32
  }
  func.func @transform_1(%arg0: i32) -> (i32, i32) {
    %c0_i32 = arith.constant 0 : i32
    %c0_i32_0 = arith.constant 0 : i32
    %c0_i32_1 = arith.constant 0 : i32
    return %c0_i32, %c0_i32_0 : i32, i32
  }
  func.func @transform_2(%arg0: i32) -> (i32, i32) {
    %c0_i32 = arith.constant 0 : i32
    %c0_i32_0 = arith.constant 0 : i32
    %c0_i32_1 = arith.constant 0 : i32
    return %c0_i32, %c0_i32_0 : i32, i32
  }
  func.func @transform_3(%arg0: i32) -> (i32, i32) {
    %c0_i32 = arith.constant 0 : i32
    %c0_i32_0 = arith.constant 0 : i32
    %c0_i32_1 = arith.constant 0 : i32
    return %c0_i32, %c0_i32_0 : i32, i32
  }
  func.func @transform_4(%arg0: i32) -> (i32, i32) {
    %c0_i32 = arith.constant 0 : i32
    %c0_i32_0 = arith.constant 0 : i32
    %c0_i32_1 = arith.constant 0 : i32
    return %c0_i32, %c0_i32_0 : i32, i32
  }
  func.func @transform_5(%arg0: i32) -> (i32, i32) {
    %c0_i32 = arith.constant 0 : i32
    %c0_i32_0 = arith.constant 0 : i32
    %c0_i32_1 = arith.constant 0 : i32
    return %c0_i32, %c0_i32_0 : i32, i32
  }
  func.func @transform_6(%arg0: i32) -> (i32, i32) {
    %c0_i32 = arith.constant 0 : i32
    %c0_i32_0 = arith.constant 0 : i32
    %c0_i32_1 = arith.constant 0 : i32
    return %c0_i32, %c0_i32_0 : i32, i32
  }
  func.func @transform_7(%arg0: i32) -> (i32, i32, i32, i32) {
    %c0_i32 = arith.constant 0 : i32
    %c0_i32_0 = arith.constant 0 : i32
    %c0_i32_1 = arith.constant 0 : i32
    %c0_i32_2 = arith.constant 0 : i32
    return %arg0, %c0_i32, %c0_i32_0, %c0_i32_1 : i32, i32, i32, i32
  }
}

</mosaic_0001>

<bundles_post_ra>
// kernel: tpu_custom_call.1
= control target key start
LH: loop header
LB: loop body
LE: loop exit
PB: predicated region body
PF: predicated region fallthrough
CT: control target
= control target key end

     0   :  { %12 = vsyncpa [#allocation6], 0  ;;  %s3864_s0 = inlined_call_operand.vmem [shape: f32[2,16,16,4], index: 0, kind: input, shape index: {}]   ;;  %s3865_s1 = inlined_call_operand.vmem [shape: bf16[36,8], index: 1, kind: input, shape index: {}]   ;;  %s3866_s2 = inlined_call_operand.vmem [shape: bf16[72,8], index: 2, kind: input, shape index: {}]   ;;  %s3867_s3 = inlined_call_operand.vmem [shape: f32[1,4], index: 3, kind: input, shape index: {}]   ;;  %s3868_s4 = inlined_call_operand.vmem [shape: f32[1,4], index: 4, kind: input, shape index: {}]   ;;  %s3869_s5 = inlined_call_operand.vmem [shape: f32[1,8], index: 5, kind: input, shape index: {}]   ;;  %s3870_s6 = inlined_call_operand.vmem [shape: f32[1,8], index: 6, kind: input, shape index: {}]   ;;  %s3871_s7 = inlined_call_operand.hbm [shape: f32[2,8,8,8], index: 7, kind: output, shape index: {}]  }
   0x1   :  { %14 = vsyncpa [#allocation6 + $0x1], 0  ;;  %s2850_s24 = smov 0   ;;  %s2852_s25 = smov 0  }
   0x2   :  { %s2854_s26 = smov 0   ;;  %s2856_s27 = smov 0  }
   0x3 LB: > { %s2871_s28 = sadd.s32 4294967295, %s2794_s27   ;;  %s2430_s29 = sadd.s32 4294967294, %s2794_s27   ;;  %s2794_s27 = sphi %s2856_s27, %s3883_s27   ;;  %s2790_s26 = sphi %s2854_s26, %s3882_s26   ;;  %s2786_s25 = sphi %s2852_s25, %s3881_s25   ;;  %s2782_s24 = sphi %s2850_s24, %s3880_s24  }
   0x4   : > { %s2875_s30 = sadd.s32 1, %s2794_s27   ;;  %s179_s8 = sadd.s32 1, %s2790_s26 }
   0x5   : > { %s176_s9 = ssub.s32 %s2794_s27, %s2875_s30  ;;  %p189_p0 = scmp.ne.s32.totalorder %s2790_s26, %s2786_s25 }
   0x6   : > { %p177_p1 = scmp.eq.s32.totalorder %s176_s9, 0  ;;  %p190_p2 = scmp.eq.s32.totalorder %s2871_s28, 1 }
   0x7   : > { %p195_p3 = scmp.ne.s32.totalorder %s2786_s25, %s2782_s24  ;;  %p196_p4 = scmp.eq.s32.totalorder %s2430_s29, 1 }
   0x8   : > { %s2886_s10 = scalar_select %p177_p1, %s2790_s26, %s179_s8  }
   0x9   : > { %p2888_p5 = por %p190_p2, %p189_p0  ;;  %p2892_p6 = por %p196_p4, %p195_p3 }
   0xa   : > { %p2433_p7 = scmp.ge.s32.totalorder %s2794_s27, 1  ;;  %p240_p8 = scmp.lt.s32.totalorder %s2794_s27, 3 }
   0xc   : > { %p241_p9 = pnand %p2433_p7, %p240_p8 }
   0xd   : > { %vm1014_vm0 = vcmask (!%p241_p9), 60416   ;;  %vm1016_vm1 = vcmask (!%p241_p9), 57344   ;;  %p272_p10 = scmp.lt.s32.totalorder (!%p241_p9), %s2871_s28, 1  ;;  %v2796_v0 = vmov (!%p241_p9), 0   ;;  %s2797_s13 = smov (!%p241_p9), 4   ;;  %vm647_vm6 = vcmask (!%p241_p9), 1043456  }
   0xe   : > { %244 = sbr.rel (%p241_p9) target bundleno = 1106 (0x452), region = 48  ;;  %778 = vrot.lane.b32.xlu0 (!%p241_p9), %v2796_v0, %s2797_s13  ;;  %1015 = vst.msk [vmem:[#allocation3] sm:$0xf] (!%p241_p9), %vm1014_vm0, %v2796_v0  ;;  %1019 = vst.msk [vmem:[#allocation3 + $0x48] sm:$0xf] (!%p241_p9), %vm1014_vm0, %v2796_v0  ;;  %vm547_vm8 = vcmask (!%p241_p9), 31744  }
   0xf   : > { %1017 = vst.msk [vmem:[#allocation3 + $0x4] sm:$0x1] (!%p241_p9), %vm1016_vm1, %v2796_v0  ;;  %1020 = vst.msk [vmem:[#allocation3 + $0x4c] sm:$0x1] (!%p241_p9), %vm1016_vm1, %v2796_v0  ;;  %v2913_v1 = vld [vmem:[%s3867_s3] ss:$0 sm:$0xff] (!%p241_p9) }
  0x10   : > { %v2918_v2 = vld [vmem:[%s3868_s4] ss:$0 sm:$0xff] (!%p241_p9)  ;;  %vm628_vm13 = vcmask (!%p241_p9), 1040384   ;;  %s2798_s23 = smov (!%p241_p9), 12   ;;  %vm629_vm15 = vsmask.f32 (!%p241_p9), 256 }
  0x11   : > { %s2799_s29 = smov (!%p241_p9), 8   ;;  %s2800_s8 = smov (!%p241_p9), 24  }
  0x12   : > { %s2801_s9 = smov (!%p241_p9), 32   ;;  %s2802_s19 = smov (!%p241_p9), 48  }
  0x13   : > { %s2803_s20 = smov (!%p241_p9), 16   ;;  %s2804_s21 = smov (!%p241_p9), 56  }
  0x14   : > { %s2806_s16 = smov (!%p241_p9), 64   ;;  %s2808_s18 = smov (!%p241_p9), [#allocation5]  }
  0x15   : > { %s273_s14 = scalar_select %p272_p10, %s2871_s28, 1 }
  0x17   : > { %s2580_s17 = sshll.u32 %s273_s14, 8 }
  0x18   : > { %s2923_s22 = scalar_lea.vmem %s3864_s0, %s2580_s17 }
  0x19   : > { %v2455_v3 = vld [vmem:[%s2923_s22 + $0x30] ss:$2 sm:$0xff]  ;;  %v2463_v4 = vld [vmem:[%s2923_s22 + $0x31] ss:$2 sm:$0xff]  ;;  %v2437_v5 = vld [vmem:[%s2923_s22 + $0x20] ss:$2 sm:$0xff] }
  0x1a   : > { %v420_v6 = vmul.f32 %v2455_v3, %v2913_v1  ;;  %v476_v7 = vmul.f32 %v2463_v4, %v2913_v1  ;;  %v301_v8 = vmul.f32 %v2913_v1, %v2437_v5  ;;  %v2447_v9 = vld [vmem:[%s2923_s22 + $0x21] ss:$2 sm:$0xff]  ;;  %v2454_v10 = vld [vmem:[%s2923_s22 + $0x10] ss:$2 sm:$0xff]  ;;  %v278_v15 = vld [vmem:[%s2923_s22] ss:$2 sm:$0xff] }
  0x1b   : > { %v2456_v11 = vld [vmem:[%s2923_s22 + $0x50] ss:$2 sm:$0xff]  ;;  %v364_v12 = vmul.f32 %v2447_v9, %v2913_v1  ;;  %v419_v13 = vmul.f32 %v2454_v10, %v2913_v1  ;;  %v2446_v16 = vld [vmem:[%s2923_s22 + $0x1] ss:$2 sm:$0xff]  ;;  %v300_v20 = vmul.f32 %v2913_v1, %v278_v15  ;;  %v2462_v35 = vld [vmem:[%s2923_s22 + $0x11] ss:$2 sm:$0xff] }
  0x1c   : > { %v421_v14 = vmul.f32 %v2456_v11, %v2913_v1  ;;  %v428_v17 = vadd.f32 %v2918_v2, %v420_v6  ;;  %v484_v18 = vadd.f32 %v2918_v2, %v476_v7  ;;  %v316_v19 = vadd.f32 %v2918_v2, %v301_v8  ;;  %v2438_v47 = vld [vmem:[%s2923_s22 + $0x40] ss:$2 sm:$0xff]  ;;  %v2448_v51 = vld [vmem:[%s2923_s22 + $0x41] ss:$2 sm:$0xff]  ;;  %v2464_v55 = vld [vmem:[%s2923_s22 + $0x51] ss:$2 sm:$0xff] }
  0x1d   : > { %v372_v21 = vadd.f32 %v2918_v2, %v364_v12  ;;  %v427_v22 = vadd.f32 %v2918_v2, %v419_v13  ;;  %v363_v24 = vmul.f32 %v2446_v16, %v2913_v1  ;;  %v315_v41 = vadd.f32 %v2918_v2, %v300_v20  ;;  %v2439_v60 = vld [vmem:[%s2923_s22 + $0x60] ss:$2 sm:$0xff]  ;;  %v2449_v61 = vld [vmem:[%s2923_s22 + $0x61] ss:$2 sm:$0xff] }
  0x1e   : > { %v429_v23 = vadd.f32 %v2918_v2, %v421_v14  ;;  %vm436_vm2 = vcmp.ge.f32.partialorder %v428_v17, 0.0  ;;  %v444_v25 = vmul.f32 0.1, %v428_v17  ;;  %vm492_vm3 = vcmp.ge.f32.partialorder %v484_v18, 0.0 }
  0x1f   : > { %v500_v26 = vmul.f32 0.1, %v484_v18  ;;  %vm324_vm4 = vcmp.ge.f32.partialorder %v316_v19, 0.0  ;;  %v332_v27 = vmul.f32 0.1, %v316_v19  ;;  %vm380_vm5 = vcmp.ge.f32.partialorder %v372_v21, 0.0 }
  0x20   : > { %v388_v28 = vmul.f32 0.1, %v372_v21  ;;  %v452_v29 = vsel %vm436_vm2, %v428_v17, %v444_v25  ;;  %vm435_vm7 = vcmp.ge.f32.partialorder %v427_v22, 0.0  ;;  %v443_v30 = vmul.f32 0.1, %v427_v22 }
  0x21   : > { %v2947_v31 = vsel %vm492_vm3, %v484_v18, %v500_v26  ;;  %v640_v32 = vpack.c.bf16 %v452_v29, %v452_v29  ;;  %v340_v33 = vsel %vm324_vm4, %v316_v19, %v332_v27  ;;  %vm437_vm9 = vcmp.ge.f32.partialorder %v429_v23, 0.0 }
  0x22   : > { %v2949_v34 = vsel %vm380_vm5, %v372_v21, %v388_v28  ;;  %v451_v37 = vsel %vm435_vm7, %v427_v22, %v443_v30  ;;  %v445_v38 = vmul.f32 0.1, %v429_v23  ;;  %v371_v42 = vadd.f32 %v2918_v2, %v363_v24  ;;  %vm3003_vm7 = vmand %vm628_vm13, %vm629_vm15 }
  0x23   : > { %v516_v36 = vadd.f32 %v2949_v34, %v340_v33  ;;  %v652_v39 = vsel %vm647_vm6, %v640_v32, 0  ;;  %v639_v40 = vpack.c.bf16 %v451_v37, %v451_v37  ;;  %v475_v45 = vmul.f32 %v2462_v35, %v2913_v1 }
  0x24   : > { %782 = vrot.lane.b32.xlu1 %v652_v39, %s2797_s13  ;;  %v2957_v44 = vsel %vm437_vm9, %v429_v23, %v445_v38  ;;  %v746_v46 = vpack.c.bf16 %v340_v33, %v340_v33  ;;  %vm323_vm10 = vcmp.ge.f32.partialorder %v315_v41, 0.0  ;;  %v331_v50 = vmul.f32 0.1, %v315_v41 }
  0x25   : > { %v524_v43 = vadd.f32 %v516_v36, %v452_v29  ;;  %v650_v48 = vsel %vm647_vm6, %v639_v40, 0  ;;  %v641_v49 = vpack.c.bf16 %v2957_v44, %v2957_v44  ;;  %vm379_vm11 = vcmp.ge.f32.partialorder %v371_v42, 0.0 }
  0x26   : > { %780 = vrot.lane.b32.xlu0 %v650_v48, %s2797_s13  ;;  %v387_v53 = vmul.f32 0.1, %v371_v42  ;;  %v483_v54 = vadd.f32 %v2918_v2, %v475_v45  ;;  %v339_v57 = vsel %vm323_vm10, %v315_v41, %v331_v50  ;;  %v756_v58 = vsel %vm647_vm6, %v746_v46, 0  ;;  %v2457_v45 = vld [vmem:[%s2923_s22 + $0x70] ss:$2 sm:$0xff] }
  0x27   : > { %v532_v52 = vadd.f32 %v524_v43, %v2947_v31  ;;  %v654_v56 = vsel %vm647_vm6, %v641_v49, 0  ;;  %v302_v59 = vmul.f32 %v2913_v1, %v2438_v47  ;;  %v745_v4 = vpack.c.bf16 %v339_v57, %v339_v57  ;;  %v2465_v50 = vld [vmem:[%s2923_s22 + $0x71] ss:$2 sm:$0xff] }
  0x28   : > { %784 = vrot.lane.b32.xlu1 %v654_v56, %s2797_s13  ;;  %v395_v63 = vsel %vm379_vm11, %v371_v42, %v387_v53  ;;  %vm491_vm12 = vcmp.ge.f32.partialorder %v483_v54, 0.0  ;;  %v499_v3 = vmul.f32 0.1, %v483_v54  ;;  %v365_v7 = vmul.f32 %v2448_v51, %v2913_v1 }
  0x29   : > { %v540_v62 = vmul.f32 0.25, %v532_v52  ;;  %v515_v5 = vadd.f32 %v395_v63, %v339_v57  ;;  %v317_v6 = vadd.f32 %v2918_v2, %v302_v59  ;;  %v477_v9 = vmul.f32 %v2464_v55, %v2913_v1  ;;  %v2450_v55 = vld [vmem:[%s2923_s22 + $0x81] ss:$2 sm:$0xff] }
  0x2a   : > { %v2978_v8 = vsel %vm491_vm12, %v483_v54, %v499_v3  ;;  %v303_v10 = vmul.f32 %v2913_v1, %v2439_v60  ;;  %v366_v11 = vmul.f32 %v2449_v61, %v2913_v1  ;;  %v754_v12 = vsel %vm647_vm6, %v745_v4, 0  ;;  %v2458_v54 = vld [vmem:[%s2923_s22 + $0x90] ss:$2 sm:$0xff] }
  0x2b   : > { %549 = vst.msk [vmem:[#allocation4 + $0x8] sm:$0xff] %vm547_vm8, %v540_v62  ;;  %v523_v13 = vadd.f32 %v515_v5, %v451_v37  ;;  %vm325_vm14 = vcmp.ge.f32.partialorder %v317_v6, 0.0  ;;  %v333_v14 = vmul.f32 0.1, %v317_v6  ;;  %830 = vrot.lane.b32.xlu0 %v754_v12, %s2798_s23  ;;  %v373_v15 = vadd.f32 %v2918_v2, %v365_v7  ;;  %v2459_v60 = vld [vmem:[%s2923_s22 + $0xb0] ss:$2 sm:$0xff] }
  0x2c   : > { %832 = vrot.lane.b32.xlu1 %v756_v58, %s2798_s23  ;;  %v485_v16 = vadd.f32 %v2918_v2, %v477_v9  ;;  %v318_v17 = vadd.f32 %v2918_v2, %v303_v10  ;;  %v374_v20 = vadd.f32 %v2918_v2, %v366_v11  ;;  %v665_v21 = vpack.c.bf16 %v395_v63, %v395_v63 }
  0x2d   : > { %v531_v18 = vadd.f32 %v523_v13, %v2978_v8  ;;  %v341_v19 = vsel %vm325_vm14, %v317_v6, %v333_v14  ;;  %vm381_vm2 = vcmp.ge.f32.partialorder %v373_v15, 0.0  ;;  %v389_v22 = vmul.f32 0.1, %v373_v15 }
  0x2e   : > { %vm493_vm3 = vcmp.ge.f32.partialorder %v485_v16, 0.0  ;;  %v501_v23 = vmul.f32 0.1, %v485_v16  ;;  %v747_v25 = vpack.c.bf16 %v341_v19, %v341_v19  ;;  %vm326_vm4 = vcmp.ge.f32.partialorder %v318_v17, 0.0 }
  0x2f   : > { %v539_v24 = vmul.f32 0.25, %v531_v18  ;;  %v334_v26 = vmul.f32 0.1, %v318_v17  ;;  %v397_v27 = vsel %vm381_vm2, %v373_v15, %v389_v22  ;;  %vm382_vm5 = vcmp.ge.f32.partialorder %v374_v20, 0.0 }
  0x30   : > { %v2991_v28 = vsel %vm493_vm3, %v485_v16, %v501_v23  ;;  %v390_v29 = vmul.f32 0.1, %v374_v20  ;;  %v517_v30 = vadd.f32 %v397_v27, %v341_v19  ;;  %v758_v32 = vsel %vm647_vm6, %v747_v25, 0  ;;  %v2460_v25 = vld [vmem:[%s2923_s22 + $0xd0] ss:$2 sm:$0xff] }
  0x31   : > { %548 = vst.msk [vmem:[#allocation4] sm:$0xff] %vm547_vm8, %v539_v24  ;;  %v342_v33 = vsel %vm326_vm4, %v318_v17, %v334_v26  ;;  %v674_v35 = vshrl.u32 %v665_v21, 16  ;;  %834 = vrot.lane.b32.xlu0 %v758_v32, %s2798_s23  ;;  %v677_v38 = vshll.u32 %v665_v21, 16  ;;  %v666_v39 = vpack.c.bf16 %v2949_v34, %v2949_v34  ;;  %v2451_v26 = vld [vmem:[%s2923_s22 + $0xa1] ss:$2 sm:$0xff] }
  0x32   : > { %v398_v36 = vsel %vm382_vm5, %v374_v20, %v390_v29  ;;  %v748_v37 = vpack.c.bf16 %v342_v33, %v342_v33  ;;  %v525_v40 = vadd.f32 %v517_v30, %v2957_v44  ;;  %v667_v43 = vpack.c.bf16 %v397_v27, %v397_v27 }
  0x33   : > { %v518_v41 = vadd.f32 %v398_v36, %v342_v33  ;;  %v676_v42 = vrot.slane %v674_v35, 7  ;;  %v681_v48 = vshrl.u32 %v666_v39, 16  ;;  %v684_v49 = vshll.u32 %v666_v39, 16 }
  0x34   : > { %v760_v46 = vsel %vm647_vm6, %v748_v37, 0  ;;  %v668_v34 = vpack.c.bf16 %v398_v36, %v398_v36  ;;  %v533_v44 = vadd.f32 %v525_v40, %v2991_v28  ;;  %v688_v52 = vshrl.u32 %v667_v43, 16  ;;  %v2440_v36 = vld [vmem:[%s2923_s22 + $0x80] ss:$2 sm:$0xff] }
  0x35   : > { %836 = vrot.lane.b32.xlu1 %v760_v46, %s2798_s23  ;;  %v679_v51 = vor.u32 %v677_v38, %v676_v42  ;;  %v691_v53 = vshll.u32 %v667_v43, 16  ;;  %v683_v56 = vrot.slane %v681_v48, 7  ;;  %v422_v59 = vmul.f32 %v2457_v45, %v2913_v1 }
  0x36   : > { %v695_v57 = vshrl.u32 %v668_v34, 16  ;;  %v698_v58 = vshll.u32 %v668_v34, 16  ;;  %v541_v61 = vmul.f32 0.25, %v533_v44  ;;  %v690_v63 = vrot.slane %v688_v52, 7  ;;  %v2452_v44 = vld [vmem:[%s2923_s22 + $0xc1] ss:$2 sm:$0xff] }
  0x37   : > { %v737_v62 = vsel %vm3003_vm7, 0, %v679_v51  ;;  %v478_v3 = vmul.f32 %v2465_v50, %v2913_v1  ;;  %v686_v4 = vor.u32 %v684_v49, %v683_v56  ;;  %v430_v6 = vadd.f32 %v2918_v2, %v422_v59  ;;  %v2453_v51 = vld [vmem:[%s2923_s22 + $0xe1] ss:$2 sm:$0xff]  ;;  %v2441_v56 = vld [vmem:[%s2923_s22 + $0xa0] ss:$2 sm:$0xff] }
  0x38   : > { %804 = vrot.lane.b32.xlu0 %v737_v62, %s2799_s29  ;;  %v697_v5 = vrot.slane %v695_v57, 7  ;;  %v423_v7 = vmul.f32 %v2458_v54, %v2913_v1  ;;  %550 = vst.msk [vmem:[#allocation4 + $0x10] sm:$0xff] %vm547_vm8, %v541_v61  ;;  %v693_v9 = vor.u32 %v691_v53, %v690_v63  ;;  %v367_v11 = vmul.f32 %v2450_v55, %v2913_v1 }
  0x39   : > { %v486_v10 = vadd.f32 %v2918_v2, %v478_v3  ;;  %v424_v12 = vmul.f32 %v2459_v60, %v2913_v1  ;;  %v738_v13 = vsel %vm3003_vm7, 0, %v686_v4  ;;  %vm438_vm9 = vcmp.ge.f32.partialorder %v430_v6, 0.0 }
  0x3a   : > { %v700_v14 = vor.u32 %v698_v58, %v697_v5  ;;  %v446_v15 = vmul.f32 0.1, %v430_v6  ;;  %806 = vrot.lane.b32.xlu1 %v738_v13, %s2799_s29  ;;  %v739_v16 = vsel %vm3003_vm7, 0, %v693_v9  ;;  %v431_v18 = vadd.f32 %v2918_v2, %v423_v7 }
  0x3b   : > { %vm494_vm10 = vcmp.ge.f32.partialorder %v486_v10, 0.0  ;;  %v502_v17 = vmul.f32 0.1, %v486_v10  ;;  %v375_v21 = vadd.f32 %v2918_v2, %v367_v11  ;;  %v432_v22 = vadd.f32 %v2918_v2, %v424_v12 }
  0x3c   : > { %808 = vrot.lane.b32.xlu0 %v739_v16, %s2799_s29  ;;  %v740_v19 = vsel %vm3003_vm7, 0, %v700_v14  ;;  %v454_v20 = vsel %vm438_vm9, %v430_v6, %v446_v15  ;;  %vm439_vm11 = vcmp.ge.f32.partialorder %v431_v18, 0.0  ;;  %v447_v29 = vmul.f32 0.1, %v431_v18 }
  0x3d   : > { %v526_v23 = vadd.f32 %v518_v41, %v454_v20  ;;  %v642_v24 = vpack.c.bf16 %v454_v20, %v454_v20  ;;  %v3037_v27 = vsel %vm494_vm10, %v486_v10, %v502_v17  ;;  %vm383_vm12 = vcmp.ge.f32.partialorder %v375_v21, 0.0  ;;  %v2466_v41 = vld [vmem:[%s2923_s22 + $0x91] ss:$2 sm:$0xff] }
  0x3e   : > { %v391_v30 = vmul.f32 0.1, %v375_v21  ;;  %810 = vrot.lane.b32.xlu1 %v740_v19, %s2799_s29  ;;  %vm440_vm13 = vcmp.ge.f32.partialorder %v432_v22, 0.0  ;;  %v448_v35 = vmul.f32 0.1, %v432_v22  ;;  %v455_v37 = vsel %vm439_vm11, %v431_v18, %v447_v29 }
  0x3f   : > { %v534_v32 = vadd.f32 %v526_v23, %v3037_v27  ;;  %v656_v33 = vsel %vm647_vm6, %v642_v24, 0  ;;  %v425_v39 = vmul.f32 %v2460_v25, %v2913_v1  ;;  %v368_v40 = vmul.f32 %v2451_v26, %v2913_v1 }
  0x40   : > { %786 = vrot.lane.b32.xlu0 %v656_v33, %s2797_s13  ;;  %v399_v38 = vsel %vm383_vm12, %v375_v21, %v391_v30  ;;  %v643_v43 = vpack.c.bf16 %v455_v37, %v455_v37  ;;  %v3047_v46 = vsel %vm440_vm13, %v432_v22, %v448_v35  ;;  %v304_v50 = vmul.f32 %v2913_v1, %v2440_v36  ;;  %v2467_v21 = vld [vmem:[%s2923_s22 + $0xb1] ss:$2 sm:$0xff]  ;;  %v2442_v36 = vld [vmem:[%s2923_s22 + $0xc0] ss:$2 sm:$0xff] }
  0x41   : > { %v542_v42 = vmul.f32 0.25, %v534_v32  ;;  %v669_v45 = vpack.c.bf16 %v399_v38, %v399_v38  ;;  %v644_v48 = vpack.c.bf16 %v3047_v46, %v3047_v46  ;;  %v433_v49 = vadd.f32 %v2918_v2, %v425_v39 }
  0x42   : > { %v376_v34 = vadd.f32 %v2918_v2, %v368_v40  ;;  %v658_v52 = vsel %vm647_vm6, %v643_v43, 0  ;;  %v479_v55 = vmul.f32 %v2466_v41, %v2913_v1  ;;  %v319_v61 = vadd.f32 %v2918_v2, %v304_v50  ;;  %v2468_v50 = vld [vmem:[%s2923_s22 + $0xd1] ss:$2 sm:$0xff] }
  0x43   : > { %551 = vst.msk [vmem:[#allocation4 + $0x18] sm:$0xff] %vm547_vm8, %v542_v42  ;;  %v702_v53 = vshrl.u32 %v669_v45, 16  ;;  %v705_v54 = vshll.u32 %v669_v45, 16  ;;  %788 = vrot.lane.b32.xlu1 %v658_v52, %s2797_s13  ;;  %v660_v57 = vsel %vm647_vm6, %v644_v48, 0  ;;  %vm441_vm14 = vcmp.ge.f32.partialorder %v433_v49, 0.0 }
  0x44   : > { %v449_v58 = vmul.f32 0.1, %v433_v49  ;;  %vm384_vm2 = vcmp.ge.f32.partialorder %v376_v34, 0.0  ;;  %v392_v60 = vmul.f32 0.1, %v376_v34  ;;  %v487_v62 = vadd.f32 %v2918_v2, %v479_v55 }
  0x45   : > { %v704_v59 = vrot.slane %v702_v53, 7  ;;  %v369_v3 = vmul.f32 %v2452_v44, %v2913_v1  ;;  %v370_v4 = vmul.f32 %v2453_v51, %v2913_v1  ;;  %v305_v5 = vmul.f32 %v2913_v1, %v2441_v56 }
  0x46   : > { %v3064_v63 = vsel %vm441_vm14, %v433_v49, %v449_v58  ;;  %v400_v9 = vsel %vm384_vm2, %v376_v34, %v392_v60  ;;  %vm327_vm3 = vcmp.ge.f32.partialorder %v319_v61, 0.0  ;;  %v335_v11 = vmul.f32 0.1, %v319_v61 }
  0x47   : > { %v707_v6 = vor.u32 %v705_v54, %v704_v59  ;;  %v645_v7 = vpack.c.bf16 %v3064_v63, %v3064_v63  ;;  %790 = vrot.lane.b32.xlu1 %v660_v57, %s2797_s13  ;;  %v670_v10 = vpack.c.bf16 %v400_v9, %v400_v9  ;;  %vm495_vm4 = vcmp.ge.f32.partialorder %v487_v62, 0.0  ;;  %v2443_v54 = vld [vmem:[%s2923_s22 + $0xe0] ss:$2 sm:$0xff] }
  0x48   : > { %v503_v12 = vmul.f32 0.1, %v487_v62  ;;  %v377_v15 = vadd.f32 %v2918_v2, %v369_v3  ;;  %v378_v16 = vadd.f32 %v2918_v2, %v370_v4  ;;  %v343_v19 = vsel %vm327_vm3, %v319_v61, %v335_v11 }
  0x49   : > { %v741_v13 = vsel %vm3003_vm7, 0, %v707_v6  ;;  %v662_v14 = vsel %vm647_vm6, %v645_v7, 0  ;;  %v709_v17 = vshrl.u32 %v670_v10, 16  ;;  %v712_v18 = vshll.u32 %v670_v10, 16  ;;  %v2461_v6 = vld [vmem:[%s2923_s22 + $0xf0] ss:$2 sm:$0xff] }
  0x4a   : > { %812 = vrot.lane.b32.xlu0 %v741_v13, %s2799_s29  ;;  %v3078_v20 = vsel %vm495_vm4, %v487_v62, %v503_v12  ;;  %v519_v22 = vadd.f32 %v399_v38, %v343_v19  ;;  %v749_v23 = vpack.c.bf16 %v343_v19, %v343_v19  ;;  %vm385_vm5 = vcmp.ge.f32.partialorder %v377_v15, 0.0  ;;  %v2469_v7 = vld [vmem:[%s2923_s22 + $0xf1] ss:$2 sm:$0xff] }
  0x4b   : > { %v393_v24 = vmul.f32 0.1, %v377_v15  ;;  %v711_v25 = vrot.slane %v709_v17, 7  ;;  %vm386_vm9 = vcmp.ge.f32.partialorder %v378_v16, 0.0  ;;  %v394_v26 = vmul.f32 0.1, %v378_v16 }
  0x4c   : > { %v320_v29 = vadd.f32 %v2918_v2, %v305_v5  ;;  %v527_v30 = vadd.f32 %v519_v22, %v455_v37  ;;  %v762_v32 = vsel %vm647_vm6, %v749_v23, 0  ;;  %v480_v35 = vmul.f32 %v2467_v21, %v2913_v1 }
  0x4d   : > { %v401_v33 = vsel %vm385_vm5, %v377_v15, %v393_v24  ;;  %v714_v39 = vor.u32 %v712_v18, %v711_v25  ;;  %v3086_v40 = vsel %vm386_vm9, %v378_v16, %v394_v26  ;;  %v306_v34 = vmul.f32 %v2913_v1, %v2442_v36 }
  0x4e   : > { %792 = vrot.lane.b32.xlu0 %v662_v14, %s2797_s13  ;;  %v671_v38 = vpack.c.bf16 %v401_v33, %v401_v33  ;;  %vm328_vm10 = vcmp.ge.f32.partialorder %v320_v29, 0.0  ;;  %v535_v41 = vadd.f32 %v527_v30, %v3078_v20  ;;  %v672_v37 = vpack.c.bf16 %v3086_v40, %v3086_v40 }
  0x4f   : > { %v336_v42 = vmul.f32 0.1, %v320_v29  ;;  %v488_v43 = vadd.f32 %v2918_v2, %v480_v35  ;;  %v742_v45 = vsel %vm3003_vm7, 0, %v714_v39  ;;  %v321_v60 = vadd.f32 %v2918_v2, %v306_v34 }
  0x50   : > { %v716_v48 = vshrl.u32 %v671_v38, 16  ;;  %v719_v49 = vshll.u32 %v671_v38, 16  ;;  %814 = vrot.lane.b32.xlu1 %v742_v45, %s2799_s29  ;;  %v543_v44 = vmul.f32 0.25, %v535_v41  ;;  %v723_v51 = vshrl.u32 %v672_v37, 16 }
  0x51   : > { %v726_v52 = vshll.u32 %v672_v37, 16  ;;  %v344_v53 = vsel %vm328_vm10, %v320_v29, %v336_v42  ;;  %vm496_vm11 = vcmp.ge.f32.partialorder %v488_v43, 0.0  ;;  %v504_v56 = vmul.f32 0.1, %v488_v43 }
  0x52   : > { %838 = vrot.lane.b32.xlu0 %v762_v32, %s2798_s23  ;;  %v718_v55 = vrot.slane %v716_v48, 7  ;;  %v520_v57 = vadd.f32 %v400_v9, %v344_v53  ;;  %552 = vst.msk [vmem:[#allocation4 + $0x20] sm:$0xff] %vm547_vm8, %v543_v44  ;;  %v725_v58 = vrot.slane %v723_v51, 7  ;;  %v750_v59 = vpack.c.bf16 %v344_v53, %v344_v53 }
  0x53   : > { %v481_v61 = vmul.f32 %v2468_v50, %v2913_v1  ;;  %v3102_v3 = vsel %vm496_vm11, %v488_v43, %v504_v56  ;;  %v307_v5 = vmul.f32 %v2913_v1, %v2443_v54  ;;  %vm329_vm12 = vcmp.ge.f32.partialorder %v321_v60, 0.0 }
  0x54   : > { %v721_v62 = vor.u32 %v719_v49, %v718_v55  ;;  %v528_v4 = vadd.f32 %v520_v57, %v3047_v46  ;;  %v728_v10 = vor.u32 %v726_v52, %v725_v58  ;;  %v764_v9 = vsel %vm647_vm6, %v750_v59, 0 }
  0x55   : > { %v337_v11 = vmul.f32 0.1, %v321_v60  ;;  %v489_v14 = vadd.f32 %v2918_v2, %v481_v61  ;;  %v322_v15 = vadd.f32 %v2918_v2, %v307_v5  ;;  %v426_v17 = vmul.f32 %v2461_v6, %v2913_v1 }
  0x56   : > { %v743_v12 = vsel %vm3003_vm7, 0, %v721_v62  ;;  %v536_v13 = vadd.f32 %v528_v4, %v3102_v3  ;;  %v744_v46 = vsel %vm3003_vm7, 0, %v728_v10  ;;  %v482_v18 = vmul.f32 %v2469_v7, %v2913_v1 }
  0x57   : > { %816 = vrot.lane.b32.xlu1 %v743_v12, %s2799_s29  ;;  %v345_v16 = vsel %vm329_vm12, %v321_v60, %v337_v11  ;;  %818 = vrot.lane.b32.xlu0 %v744_v46, %s2799_s29  ;;  %vm497_vm13 = vcmp.ge.f32.partialorder %v489_v14, 0.0  ;;  %v505_v21 = vmul.f32 0.1, %v489_v14  ;;  %vm330_vm14 = vcmp.ge.f32.partialorder %v322_v15, 0.0 }
  0x58   : > { %v544_v19 = vmul.f32 0.25, %v536_v13  ;;  %v521_v22 = vadd.f32 %v401_v33, %v345_v16  ;;  %v751_v23 = vpack.c.bf16 %v345_v16, %v345_v16  ;;  %v338_v24 = vmul.f32 0.1, %v322_v15 }
  0x59   : > { %v434_v25 = vadd.f32 %v2918_v2, %v426_v17  ;;  %v3122_v26 = vsel %vm497_vm13, %v489_v14, %v505_v21  ;;  %v490_v30 = vadd.f32 %v2918_v2, %v482_v18  ;;  %v556_v44 = vpack.c.bf16 %v2978_v8, %v2978_v8  ;;  %v979_v14 = vld [vmem:[#allocation2 + $0x4] sm:$0x1] }
  0x5a   : > { %553 = vst.msk [vmem:[#allocation4 + $0x28] sm:$0xff] %vm547_vm8, %v544_v19  ;;  %v529_v29 = vadd.f32 %v521_v22, %v3064_v63  ;;  %v766_v1 = vsel %vm647_vm6, %v751_v23, 0  ;;  %v346_v32 = vsel %vm330_vm14, %v322_v15, %v338_v24  ;;  %v557_v51 = vpack.c.bf16 %v2947_v31, %v2947_v31 }
  0x5b   : > { %840 = vrot.lane.b32.xlu1 %v764_v9, %s2798_s23  ;;  %vm442_vm2 = vcmp.ge.f32.partialorder %v434_v25, 0.0  ;;  %v450_v33 = vmul.f32 0.1, %v434_v25  ;;  %842 = vrot.lane.b32.xlu0 %v766_v1, %s2798_s23  ;;  %v522_v36 = vadd.f32 %v3086_v40, %v346_v32  ;;  %v752_v39 = vpack.c.bf16 %v346_v32, %v346_v32 }
  0x5c   : > { %v537_v35 = vadd.f32 %v529_v29, %v3122_v26  ;;  %vm498_vm3 = vcmp.ge.f32.partialorder %v490_v30, 0.0  ;;  %v506_v41 = vmul.f32 0.1, %v490_v30  ;;  %v565_v53 = vshrl.u32 %v556_v44, 16 }
  0x5d   : > { %v458_v38 = vsel %vm442_vm2, %v434_v25, %v450_v33  ;;  %v768_v2 = vsel %vm647_vm6, %v752_v39, 0  ;;  %v558_v54 = vpack.c.bf16 %v2991_v28, %v2991_v28  ;;  %v572_v56 = vshrl.u32 %v557_v51, 16  ;;  %v983_v25 = vld [vmem:[#allocation2 + $0xc] sm:$0x1] }
  0x5e   : > { %v545_v63 = vmul.f32 0.25, %v537_v35  ;;  %v530_v37 = vadd.f32 %v522_v36, %v458_v38  ;;  %v646_v42 = vpack.c.bf16 %v458_v38, %v458_v38  ;;  %v3133_v43 = vsel %vm498_vm3, %v490_v30, %v506_v41  ;;  %v987_v35 = vld [vmem:[#allocation2 + $0x14] sm:$0x1] }
  0x5f   : > { %844 = vrot.lane.b32.xlu1 %v768_v2, %s2798_s23  ;;  %v567_v58 = vrot.slane %v565_v53, 7  ;;  %v568_v59 = vshll.u32 %v556_v44, 16  ;;  %v574_v60 = vrot.slane %v572_v56, 7  ;;  %v575_v61 = vshll.u32 %v557_v51, 16 }
  0x60   : > { %554 = vst.msk [vmem:[#allocation4 + $0x30] sm:$0xff] %vm547_vm8, %v545_v63  ;;  %v538_v45 = vadd.f32 %v530_v37, %v3133_v43  ;;  %v664_v48 = vsel %vm647_vm6, %v646_v42, 0  ;;  %v582_v8 = vshll.u32 %v558_v54, 16  ;;  %vm874_vm4 = vcmask 64512   ;;  %v991_v42 = vld [vmem:[#allocation2 + $0x1c] sm:$0x1] }
  0x61   : > { %794 = vrot.lane.b32.xlu0 %v664_v48, %s2797_s13  ;;  %v570_v4 = vor.u32 %v568_v59, %v567_v58  ;;  %v577_v6 = vor.u32 %v575_v61, %v574_v60  ;;  %vm893_vm5 = vcmask 97280   ;;  %vm977_vm9 = vcmask 122880  }
  0x62   : > { %v546_v40 = vmul.f32 0.25, %v538_v45  ;;  %vm975_vm10 = vcmask 125952   ;;  %vm3157_vm11 = vmand %vm977_vm9, %vm629_vm15  ;;  %v559_v1 = vpack.c.bf16 %v3037_v27, %v3037_v27  ;;  %v561_v56 = vpack.c.bf16 %v3102_v3, %v3102_v3 }
  0x63   : > { %820 = vrot.lane.b32.xlu1 %v2796_v0, %s2799_s29  ;;  %v631_v28 = vsel %vm3003_vm7, 0, %v570_v4  ;;  %v632_v11 = vsel %vm3003_vm7, 0, %v577_v6  ;;  %vm1276_vm15 = vcmask 130048   ;;  %vm1285_vm12 = vcmask 162816  }
  0x64   : > { %555 = vst.msk [vmem:[#allocation4 + $0x38] sm:$0xff] %vm547_vm8, %v546_v40  ;;  %v600_v4 = vshrl.u32 %v561_v56, 16  ;;  %vm1302_vm13 = vcmask 195584   ;;  %vm1319_vm14 = vcmask 228352   ;;  %vm1328_vm2 = vcmask 261120  }
  0x65   : > { %846 = vrot.lane.b32.xlu0 %v2796_v0, %s2798_s23  ;;  %v579_v0 = vshrl.u32 %v558_v54, 16  ;;  %v589_v54 = vshll.u32 %v559_v1, 16  ;;  %vm1385_vm3 = vcmask 293888  }
  0x67   : > { %v581_v5 = vrot.slane %v579_v0, 7 }
  0x69   : > { %v584_v10 = vor.u32 %v582_v8, %v581_v5 }
  0x6b   : > { %v633_v21 = vsel %vm3003_vm7, 0, %v584_v10  ;;  %v602_v10 = vrot.slane %v600_v4, 7 }
  0x80   : > { %v779_v49 = vpop.permute.xlu0 %778 }
  0x81   : > { %v849_v31 = vsel %vm547_vm8, 0, %v779_v49  ;;  %v586_v49 = vshrl.u32 %v559_v1, 16 }
  0x83   : > { %v588_v53 = vrot.slane %v586_v49, 7 }
  0x85   : > { %v591_v59 = vor.u32 %v589_v54, %v588_v53 }
  0x87   : > { %v634_v5 = vsel %vm3003_vm7, 0, %v591_v59 }
  0x96   : > { %v783_v34 = vpop.permute.xlu1 %782 }
  0x97   : > { %v855_v19 = vsel %vm547_vm8, %v632_v11, %v783_v34 }
  0x98   : > { %v781_v50 = vpop.permute.xlu0 %780 }
  0x99   : > { %v852_v46 = vsel %vm547_vm8, %v631_v28, %v781_v50 }
  0x9a   : > { %v785_v52 = vpop.permute.xlu1 %784 }
  0x9b   : > { %v858_v39 = vsel %vm547_vm8, %v633_v21, %v785_v52 }
  0x9d   : > { %v831_v55 = vpop.permute.xlu0 %830 }
  0x9e   : > { %v833_v57 = vpop.permute.xlu1 %832 }
  0xa3   : > { %v835_v62 = vpop.permute.xlu0 %834 }
  0xa7   : > { %v837_v7 = vpop.permute.xlu1 %836 }
  0xaa   : > { %v805_v9 = vpop.permute.xlu0 %804 }
  0xab   : > { %v876_v12 = vsel %vm874_vm4, %v849_v31, %v805_v9  ;;  %v603_v9 = vshll.u32 %v561_v56, 16 }
  0xac   : > { %v895_v15 = vsel %vm893_vm5, %v876_v12, %v831_v55  ;;  %v807_v18 = vpop.permute.xlu1 %806  ;;  %v560_v55 = vpack.c.bf16 %v3078_v20, %v3078_v20  ;;  %v562_v20 = vpack.c.bf16 %v3122_v26, %v3122_v26  ;;  %v563_v26 = vpack.c.bf16 %v3133_v43, %v3133_v43 }
  0xad   : > { %v2470_v16 = vcombine.low %v895_v15, %v895_v15  ;;  %v2471_v17 = vcombine.high %v895_v15, %v895_v15  ;;  %v878_v22 = vsel %vm874_vm4, %v852_v46, %v807_v18  ;;  %v605_v43 = vor.u32 %v603_v9, %v602_v10 }
  0xae   : > { %v809_v23 = vpop.permute.xlu0 %808  ;;  %v897_v29 = vsel %vm893_vm5, %v878_v22, %v833_v57  ;;  %v593_v61 = vshrl.u32 %v560_v55, 16  ;;  %v596_v31 = vshll.u32 %v560_v55, 16  ;;  %v607_v28 = vshrl.u32 %v562_v20, 16 }
  0xaf   : > { %976 = vst.msk [vmem:[#allocation2] sm:$0xf] %vm975_vm10, %v2470_v16  ;;  %v980_v24 = vsel %vm3157_vm11, %v2471_v17, %v979_v14  ;;  %v880_v30 = vsel %vm874_vm4, %v855_v19, %v809_v23  ;;  %v2472_v32 = vcombine.low %v897_v29, %v897_v29  ;;  %v2473_v33 = vcombine.high %v897_v29, %v897_v29  ;;  %v995_v19 = vld [vmem:[#allocation2 + $0x24] sm:$0x1] }
  0xb0   : > { %981 = vst [vmem:[#allocation2 + $0x4] sm:$0x1] %v980_v24  ;;  %v899_v36 = vsel %vm893_vm5, %v880_v30, %v835_v62  ;;  %v811_v63 = vpop.permute.xlu1 %810  ;;  %v609_v17 = vrot.slane %v607_v28, 7  ;;  %v610_v18 = vshll.u32 %v562_v20, 16  ;;  %v614_v24 = vshrl.u32 %v563_v26, 16 }
  0xb1   : > { %v2474_v38 = vcombine.low %v899_v36, %v899_v36  ;;  %v2475_v41 = vcombine.high %v899_v36, %v899_v36  ;;  %982 = vst.msk [vmem:[#allocation2 + $0x8] sm:$0xf] %vm975_vm10, %v2472_v32  ;;  %v984_v2 = vsel %vm3157_vm11, %v2473_v33, %v983_v25  ;;  %v882_v37 = vsel %vm874_vm4, %v858_v39, %v811_v63 }
  0xb2   : > { %985 = vst [vmem:[#allocation2 + $0xc] sm:$0x1] %v984_v2  ;;  %v901_v45 = vsel %vm893_vm5, %v882_v37, %v837_v7  ;;  %v787_v50 = vpop.permute.xlu0 %786  ;;  %v595_v7 = vrot.slane %v593_v61, 7  ;;  %v612_v30 = vor.u32 %v610_v18, %v609_v17  ;;  %v636_v32 = vsel %vm3003_vm7, 0, %v605_v43 }
  0xb3   : > { %986 = vst.msk [vmem:[#allocation2 + $0x10] sm:$0xf] %vm975_vm10, %v2474_v38  ;;  %v988_v27 = vsel %vm3157_vm11, %v2475_v41, %v987_v35  ;;  %v2476_v48 = vcombine.low %v901_v45, %v901_v45  ;;  %v2477_v40 = vcombine.high %v901_v45, %v901_v45  ;;  %v861_v11 = vsel %vm547_vm8, %v634_v5, %v787_v50 }
  0xb4   : > { %989 = vst [vmem:[#allocation2 + $0x14] sm:$0x1] %v988_v27  ;;  %v598_v16 = vor.u32 %v596_v31, %v595_v7  ;;  %v616_v35 = vrot.slane %v614_v24, 7  ;;  %v617_v36 = vshll.u32 %v563_v26, 16  ;;  %v637_v41 = vsel %vm3003_vm7, 0, %v612_v30 }
  0xb5   : > { %990 = vst.msk [vmem:[#allocation2 + $0x18] sm:$0xf] %vm975_vm10, %v2476_v48  ;;  %v992_v34 = vsel %vm3157_vm11, %v2477_v40, %v991_v42  ;;  %v789_v51 = vpop.permute.xlu1 %788  ;;  %v999_v27 = vld [vmem:[#allocation2 + $0x2c] sm:$0x1] }
  0xb6   : > { %v3187_v44 = vld [vmem:[#allocation2] sm:$0xf]  ;;  %993 = vst [vmem:[#allocation2 + $0x1c] sm:$0x1] %v992_v34  ;;  %v635_v29 = vsel %vm3003_vm7, 0, %v598_v16  ;;  %v619_v48 = vor.u32 %v617_v36, %v616_v35 }
  0xb7   : > { %v2496_v52 = vcombine.low %v3187_v44, %v3187_v44  ;;  %v864_v39 = vsel %vm547_vm8, %v635_v29, %v789_v51  ;;  %v1003_v34 = vld [vmem:[#allocation2 + $0x34] sm:$0x1] }
  0xb8   : > { %v3202_v60 = vld [vmem:[#allocation2 + $0x8] sm:$0xf]  ;;  %v638_v4 = vsel %vm3003_vm7, 0, %v619_v48 }
  0xb9   : > { %1159 = vrot.lane.b32.xlu1 %v2496_v52, %s2797_s13  ;;  %v791_v62 = vpop.permute.xlu1 %790  ;;  %v3210_v3 = vcombine.low %v3202_v60, %v3202_v60 }
  0xba   : > { %v3196_v57 = vld [vmem:[#allocation2 + $0x10] sm:$0xf]  ;;  %v867_v38 = vsel %vm547_vm8, %v636_v32, %v791_v62  ;;  %v1007_v62 = vld [vmem:[#allocation2 + $0x3c] sm:$0x1] }
  0xbb   : > { %v3200_v58 = vcombine.low %v3196_v57, %v3196_v57 }
  0xbc   : > { %v813_v0 = vpop.permute.xlu0 %812  ;;  %v3214_v6 = vld [vmem:[#allocation2 + $0x18] sm:$0xf] }
  0xbd   : > { %1163 = vrot.lane.b32.xlu1 %v3200_v58, %s2797_s13  ;;  %v3223_v14 = vcombine.low %v3214_v6, %v3214_v6  ;;  %v884_v15 = vsel %vm874_vm4, %v861_v11, %v813_v0  ;;  %v1022_v11 = vld [vmem:[#allocation2 + $0x4] sm:$0x1] }
  0xc0   : > { %v793_v8 = vpop.permute.xlu0 %792 }
  0xc1   : > { %1194 = vrot.lane.b32.xlu1 %v3210_v3, %s2800_s8  ;;  %v870_v52 = vsel %vm547_vm8, %v637_v41, %v793_v8 }
  0xc2   : > { %v815_v12 = vpop.permute.xlu1 %814 }
  0xc3   : > { %v886_v63 = vsel %vm874_vm4, %v864_v39, %v815_v12  ;;  %v1011_v12 = vld [vmem:[#allocation2 + $0x44] sm:$0x1] }
  0xc4   : > { %v839_v46 = vpop.permute.xlu0 %838 }
  0xc5   : > { %v903_v21 = vsel %vm893_vm5, %v884_v15, %v839_v46  ;;  %1198 = vrot.lane.b32.xlu1 %v3223_v14, %s2800_s8 }
  0xc6   : > { %v2478_v22 = vcombine.low %v903_v21, %v903_v21  ;;  %v2479_v23 = vcombine.high %v903_v21, %v903_v21 }
  0xc8   : > { %994 = vst.msk [vmem:[#allocation2 + $0x20] sm:$0xf] %vm975_vm10, %v2478_v22  ;;  %v996_v25 = vsel %vm3157_vm11, %v2479_v23, %v995_v19  ;;  %v2488_v19 = vcombine.low %v3187_v44, %v1022_v11  ;;  %v1026_v22 = vld [vmem:[#allocation2 + $0x14] sm:$0x1] }
  0xc9   : > { %997 = vst [vmem:[#allocation2 + $0x24] sm:$0x1] %v996_v25  ;;  %v817_v1 = vpop.permute.xlu1 %816  ;;  %v819_v33 = vpop.permute.xlu0 %818  ;;  %v2490_v25 = vcombine.low %v3196_v57, %v1026_v22 }
  0xca   : > { %v888_v37 = vsel %vm874_vm4, %v867_v38, %v817_v1  ;;  %v890_v56 = vsel %vm874_vm4, %v870_v52, %v819_v33  ;;  %v1082_v24 = vshll.u32 %v2488_v19, 16  ;;  %v1080_v35 = vshrl.u32 %v2488_v19, 16  ;;  %v1024_v38 = vld [vmem:[#allocation2 + $0xc] sm:$0x1] }
  0xcb   : > { %v1096_v32 = vshll.u32 %v2490_v25, 16  ;;  %v1094_v41 = vshrl.u32 %v2490_v25, 16 }
  0xcc   : > { %v1084_v1 = vrot.slane %v1082_v24, 1 }
  0xcd   : > { %v841_v2 = vpop.permute.xlu1 %840  ;;  %v843_v45 = vpop.permute.xlu0 %842  ;;  %v1098_v39 = vrot.slane %v1096_v32, 1 }
  0xce   : > { %v905_v42 = vsel %vm893_vm5, %v886_v63, %v841_v2  ;;  %v907_v50 = vsel %vm893_vm5, %v888_v37, %v843_v45  ;;  %v1085_v36 = vor.u32 %v1084_v1, %v1080_v35  ;;  %v2489_v2 = vcombine.low %v3202_v60, %v1024_v38  ;;  %v1028_v37 = vld [vmem:[#allocation2 + $0x1c] sm:$0x1] }
  0xcf   : > { %v2480_v40 = vcombine.low %v905_v42, %v905_v42  ;;  %v2481_v49 = vcombine.high %v905_v42, %v905_v42  ;;  %v3244_v51 = vld [vmem:[#allocation2 + $0x20] sm:$0xf]  ;;  %v2482_v53 = vcombine.low %v907_v50, %v907_v50  ;;  %v2483_v54 = vcombine.high %v907_v50, %v907_v50 }
  0xd0   : > { %v3249_v55 = vcombine.low %v3244_v51, %v3244_v51  ;;  %v3297_v63 = vor.u32 %v1098_v39, %v1094_v41  ;;  %v2491_v42 = vcombine.low %v3214_v6, %v1028_v37  ;;  %v1030_v45 = vld [vmem:[#allocation2 + $0x24] sm:$0x1] }
  0xd1   : > { %998 = vst.msk [vmem:[#allocation2 + $0x28] sm:$0xf] %vm975_vm10, %v2480_v40  ;;  %v1000_v59 = vsel %vm3157_vm11, %v2481_v49, %v999_v27  ;;  %v845_v0 = vpop.permute.xlu1 %844  ;;  %1002 = vst.msk [vmem:[#allocation2 + $0x30] sm:$0xf] %vm975_vm10, %v2482_v53  ;;  %v1004_v61 = vsel %vm3157_vm11, %v2483_v54, %v1003_v34  ;;  %v1089_v27 = vshll.u32 %v2489_v2, 16  ;;  %v2492_v40 = vcombine.low %v3244_v51, %v1030_v45 }
  0xd2   : > { %1001 = vst [vmem:[#allocation2 + $0x2c] sm:$0x1] %v1000_v59  ;;  %v909_v20 = vsel %vm893_vm5, %v890_v56, %v845_v0  ;;  %1167 = vrot.lane.b32.xlu1 %v3249_v55, %s2797_s13  ;;  %1005 = vst [vmem:[#allocation2 + $0x34] sm:$0x1] %v1004_v61  ;;  %v1103_v48 = vshll.u32 %v2491_v42, 16  ;;  %v1087_v34 = vshrl.u32 %v2489_v2, 16 }
  0xd3   : > { %v2484_v5 = vcombine.low %v909_v20, %v909_v20  ;;  %v2485_v8 = vcombine.high %v909_v20, %v909_v20  ;;  %v795_v7 = vpop.permute.xlu0 %794  ;;  %v1110_v52 = vshll.u32 %v2492_v40, 16  ;;  %v1108_v0 = vshrl.u32 %v2492_v40, 16 }
  0xd4   : > { %v873_v28 = vsel %vm547_vm8, %v638_v4, %v795_v7  ;;  %v1105_v50 = vrot.slane %v1103_v48, 1  ;;  %v2705_v4 = vld [vmem:[%s3865_s1] sm:$0xff]   ;;  %vm1398_vm8 = vcmask 1041408  }
  0xd5   : > { %1006 = vst.msk [vmem:[#allocation2 + $0x38] sm:$0xf] %vm975_vm10, %v2484_v5  ;;  %v1008_v31 = vsel %vm3157_vm11, %v2485_v8, %v1007_v62  ;;  %v821_v26 = vpop.permute.xlu1 %820  ;;  %v1112_v56 = vrot.slane %v1110_v52, 1  ;;  %2606 = vmatprep.subr.bf16.mxu0 %v2705_v4 }
  0xd6   : > { %1009 = vst [vmem:[#allocation2 + $0x3c] sm:$0x1] %v1008_v31  ;;  %v892_v10 = vsel %vm874_vm4, %v873_v28, %v821_v26  ;;  %2607 = vmatpush3.bf16.msra.mxu0 %v2705_v4  ;;  %v2706_v31 = vld [vmem:[%s3865_s1 + $0x8] sm:$0xff]  }
  0xd7   : > { %v847_v9 = vpop.permute.xlu0 %846  ;;  %2608 = vmatprep.subr.bf16.mxu0 %v2706_v31 }
  0xd8   : > { %v911_v15 = vsel %vm893_vm5, %v892_v10, %v847_v9  ;;  %v3269_v17 = vld [vmem:[#allocation2 + $0x30] sm:$0xf]  ;;  %v3277_v43 = vld [vmem:[#allocation2 + $0x28] sm:$0xf] }
  0xd9   : > { %v2486_v46 = vcombine.low %v911_v15, %v911_v15  ;;  %v2487_v16 = vcombine.high %v911_v15, %v911_v15  ;;  %v2502_v18 = vcombine.low %v3269_v17, %v3269_v17  ;;  %v2501_v23 = vcombine.low %v3277_v43, %v3277_v43  ;;  %v1034_v49 = vld [vmem:[#allocation2 + $0x34] sm:$0x1]  ;;  %v1032_v62 = vld [vmem:[#allocation2 + $0x2c] sm:$0x1] }
  0xda   : > { %v2494_v53 = vcombine.low %v3269_v17, %v1034_v49  ;;  %v2493_v8 = vcombine.low %v3277_v43, %v1032_v62  ;;  %2609 = vmatpush3.bf16.msra.mxu0 %v2706_v31  ;;  %v2707_v10 = vld [vmem:[%s3865_s1 + $0x10] ss:$0 sps:$4 sm:$0x33]  }
  0xdb   : > { %1010 = vst.msk [vmem:[#allocation2 + $0x40] sm:$0xf] %vm975_vm10, %v2486_v46  ;;  %v1012_v21 = vsel %vm3157_vm11, %v2487_v16, %v1011_v12  ;;  %1171 = vrot.lane.b32.xlu1 %v2502_v18, %s2797_s13  ;;  %2638 = vmatprep.subr.msk.bf16.mxu0 %vm1398_vm8, %v2707_v10  ;;  %v1400_v12 = vsel %vm1398_vm8, %v2707_v10, 0  ;;  %vm1617_vm8 = vcmask 1044480  }
  0xdc   : > { %1013 = vst [vmem:[#allocation2 + $0x44] sm:$0x1] %v1012_v21  ;;  %v3283_v29 = vld [vmem:[#allocation2 + $0x38] sm:$0xf]  ;;  %v1124_v59 = vshll.u32 %v2494_v53, 16  ;;  %v1122_v20 = vshrl.u32 %v2494_v53, 16 }
  0xdd   : > { %v2503_v13 = vcombine.low %v3283_v29, %v3283_v29  ;;  %v1036_v7 = vld [vmem:[#allocation2 + $0x3c] sm:$0x1]  ;;  %v1117_v28 = vshll.u32 %v2493_v8, 16  ;;  %v1115_v15 = vshrl.u32 %v2493_v8, 16 }
  0xde   : > { %v1126_v61 = vrot.slane %v1124_v59, 1  ;;  %v2495_v26 = vcombine.low %v3283_v29, %v1036_v7  ;;  %2611 = vmatpush3.bf16.msra.mxu0 %v1400_v12 }
  0xdf   : > { %1202 = vrot.lane.b32.xlu1 %v2501_v23, %s2800_s8  ;;  %v1119_v9 = vrot.slane %v1117_v28, 1 }
  0xe0   : > { %v1127_v5 = vor.u32 %v1126_v61, %v1122_v20  ;;  %v1131_v11 = vshll.u32 %v2495_v26, 16 }
  0xe1   : > { %v1120_v46 = vor.u32 %v1119_v9, %v1115_v15 }
  0xe2   : > { %v3288_v30 = vld [vmem:[#allocation2 + $0x40] sm:$0xf]  ;;  %v1133_v16 = vrot.slane %v1131_v11, 1 }
  0xe3   : > { %v2504_v33 = vcombine.low %v3288_v30, %v3288_v30  ;;  %1206 = vrot.lane.b32.xlu1 %v2503_v13, %s2800_s8  ;;  %v1038_v21 = vld [vmem:[#allocation2 + $0x44] sm:$0x1] }
  0xe4   : > { %v2505_v22 = vcombine.low %v3288_v30, %v1038_v21 }
  0xe5   : > { %1208 = vrot.lane.b32.xlu0 %v2504_v33, %s2800_s8 }
  0xe6   : > { %v1214_v25 = vshrl.u32 %v2505_v22, 16 }
  0xe7   : > { %1135 = vrot.lane.b32.xlu1 %v1085_v36, %s2799_s29 }
  0xe9   : > { %1161 = vrot.lane.b32.xlu0 %v3210_v3, %s2797_s13  ;;  %v1091_v3 = vrot.slane %v1089_v27, 1 }
  0xeb   : > { %1139 = vrot.lane.b32.xlu1 %v3297_v63, %s2799_s29 }
  0xed   : > { %1165 = vrot.lane.b32.xlu0 %v3223_v14, %s2797_s13  ;;  %v1092_v14 = vor.u32 %v1091_v3, %v1087_v34 }
  0xef   : > { %1175 = vrot.lane.b32.xlu1 %v1085_v36, %s2798_s23 }
  0xf1   : > { %1196 = vrot.lane.b32.xlu0 %v3200_v58, %s2800_s8  ;;  %v1101_v58 = vshrl.u32 %v2491_v42, 16 }
  0xf3   : > { %1179 = vrot.lane.b32.xlu1 %v3297_v63, %s2798_s23  ;;  %v1106_v54 = vor.u32 %v1105_v50, %v1101_v58 }
  0xf5   : > { %1200 = vrot.lane.b32.xlu0 %v3249_v55, %s2800_s8  ;;  %v1113_v55 = vor.u32 %v1112_v56, %v1108_v0 }
  0xf7   : > { %1220 = vrot.lane.b32.xlu1 %v1092_v14, %s2801_s9 }
  0xf9   : > { %1169 = vrot.lane.b32.xlu0 %v2501_v23, %s2797_s13  ;;  %v1216_v23 = vshll.u32 %v2505_v22, 16 }
  0xfb   : > { %1224 = vrot.lane.b32.xlu1 %v1106_v54, %s2801_s9  ;;  %v1218_v24 = vrot.slane %v1216_v23, 1 }
  0xfd   : > { %1173 = vrot.lane.b32.xlu0 %v2503_v13, %s2797_s13  ;;  %v1219_v13 = vor.u32 %v1218_v24, %v1214_v25  ;;  %s2805_s13 = smov 40  }
  0xff   : > { %1143 = vrot.lane.b32.xlu1 %v1113_v55, %s2799_s29 }
 0x101   : > { %1204 = vrot.lane.b32.xlu0 %v2502_v18, %s2800_s8  ;;  %v1129_v18 = vshrl.u32 %v2495_v26, 16 }
 0x103   : > { %1147 = vrot.lane.b32.xlu1 %v1127_v5, %s2799_s29  ;;  %v1134_v19 = vor.u32 %v1133_v16, %v1129_v18 }
 0x105   : > { %1137 = vrot.lane.b32.xlu0 %v1092_v14, %s2799_s29 }
 0x107   : > { %1183 = vrot.lane.b32.xlu1 %v1113_v55, %s2798_s23 }
 0x109   : > { %1141 = vrot.lane.b32.xlu0 %v1106_v54, %s2799_s29 }
 0x10b   : > { %1187 = vrot.lane.b32.xlu1 %v1127_v5, %s2798_s23 }
 0x10d   : > { %1177 = vrot.lane.b32.xlu0 %v1092_v14, %s2798_s23 }
 0x10f   : > { %1228 = vrot.lane.b32.xlu1 %v1120_v46, %s2801_s9 }
 0x111   : > { %1181 = vrot.lane.b32.xlu0 %v1106_v54, %s2798_s23 }
 0x113   : > { %1232 = vrot.lane.b32.xlu1 %v1134_v19, %s2801_s9 }
 0x115   : > { %1222 = vrot.lane.b32.xlu0 %v3297_v63, %s2801_s9 }
 0x119   : > { %1226 = vrot.lane.b32.xlu0 %v1113_v55, %s2801_s9 }
 0x11d   : > { %1145 = vrot.lane.b32.xlu0 %v1120_v46, %s2799_s29 }
 0x121   : > { %1149 = vrot.lane.b32.xlu0 %v1134_v19, %s2799_s29 }
 0x125   : > { %1185 = vrot.lane.b32.xlu0 %v1120_v46, %s2798_s23 }
 0x129   : > { %1189 = vrot.lane.b32.xlu0 %v1134_v19, %s2798_s23 }
 0x12b   : > { %v1160_v1 = vpop.permute.xlu1 %1159 }
 0x12d   : > { %1230 = vrot.lane.b32.xlu0 %v1127_v5, %s2801_s9 }
 0x12f   : > { %v1164_v32 = vpop.permute.xlu1 %1163 }
 0x131   : > { %1234 = vrot.lane.b32.xlu0 %v1219_v13, %s2801_s9 }
 0x133   : > { %v1195_v33 = vpop.permute.xlu1 %1194 }
 0x137   : > { %v1199_v35 = vpop.permute.xlu1 %1198 }
 0x144   : > { %v3350_v36 = vpop.permute.xlu1 %1167 }
 0x14d   : > { %v3352_v39 = vpop.permute.xlu1 %1171 }
 0x151   : > { %v3354_v30 = vpop.permute.xlu1 %1202 }
 0x155   : > { %v3358_v41 = vpop.permute.xlu1 %1206 }
 0x157   : > { %v3356_v38 = vpop.permute.xlu0 %1208 }
 0x159   : > { %v1136_v2 = vpop.permute.xlu1 %1135 }
 0x15a   : > { %v1245_v52 = vsel %vm874_vm4, %v3187_v44, %v1136_v2 }
 0x15b   : > { %v1162_v63 = vpop.permute.xlu0 %1161  ;;  %v1261_v54 = vsel %vm893_vm5, %v1245_v52, %v1160_v1 }
 0x15c   : > { %v1277_v44 = vsel %vm1276_vm15, %v1261_v54, %v1160_v1 }
 0x15d   : > { %v1140_v42 = vpop.permute.xlu1 %1139 }
 0x15e   : > { %v1249_v0 = vsel %vm874_vm4, %v3196_v57, %v1140_v42 }
 0x15f   : > { %v1166_v37 = vpop.permute.xlu0 %1165  ;;  %v1265_v62 = vsel %vm893_vm5, %v1249_v0, %v1164_v32 }
 0x161   : > { %v1176_v3 = vpop.permute.xlu1 %1175 }
 0x162   : > { %v1287_v20 = vsel %vm1285_vm12, %v1277_v44, %v1176_v3 }
 0x163   : > { %v1197_v27 = vpop.permute.xlu0 %1196  ;;  %v1304_v7 = vsel %vm1302_vm13, %v1287_v20, %v1195_v33 }
 0x164   : > { %v1320_v9 = vsel %vm1319_vm14, %v1304_v7, %v1195_v33  ;;  %v3450_v7 = vld [vmem:[#allocation3] sm:$0xf] }
 0x165   : > { %v1180_v49 = vpop.permute.xlu1 %1179 }
 0x167   : > { %v1201_v45 = vpop.permute.xlu0 %1200 }
 0x169   : > { %v1221_v14 = vpop.permute.xlu1 %1220 }
 0x16a   : > { %v1330_v46 = vsel %vm1328_vm2, %v1320_v9, %v1221_v14  ;;  %v1719_v9 = vld [vmem:[#allocation3 + $0x48] sm:$0xf] }
 0x16b   : > { %v3360_v48 = vpop.permute.xlu0 %1169 }
 0x16d   : > { %v1225_v56 = vpop.permute.xlu1 %1224 }
 0x16f   : > { %v3362_v40 = vpop.permute.xlu0 %1173 }
 0x171   : > { %v1144_v57 = vpop.permute.xlu1 %1143 }
 0x173   : > { %v3364_v34 = vpop.permute.xlu0 %1204 }
 0x175   : > { %v1148_v19 = vpop.permute.xlu1 %1147 }
 0x177   : > { %v1138_v50 = vpop.permute.xlu0 %1137 }
 0x178   : > { %v1247_v53 = vsel %vm874_vm4, %v3202_v60, %v1138_v50 }
 0x179   : > { %v1263_v59 = vsel %vm893_vm5, %v1247_v53, %v1162_v63 }
 0x17a   : > { %v1278_v60 = vsel %vm1276_vm15, %v1263_v59, %v1162_v63  ;;  %v1253_v63 = vsel %vm874_vm4, %v3244_v51, %v1144_v57 }
 0x17b   : > { %v1142_v58 = vpop.permute.xlu0 %1141 }
 0x17c   : > { %v1251_v55 = vsel %vm874_vm4, %v3214_v6, %v1142_v58  ;;  %v1279_v6 = vsel %vm1276_vm15, %v1265_v62, %v1164_v32  ;;  %v1184_v32 = vpop.permute.xlu1 %1183 }
 0x17d   : > { %v1267_v4 = vsel %vm893_vm5, %v1251_v55, %v1166_v37  ;;  %v1291_v26 = vsel %vm1285_vm12, %v1279_v6, %v1180_v49  ;;  %v1702_v6 = vld [vmem:[#allocation3 + $0x4] sm:$0x1] }
 0x17e   : > { %v1280_v28 = vsel %vm1276_vm15, %v1267_v4, %v1166_v37  ;;  %v1308_v15 = vsel %vm1302_vm13, %v1291_v26, %v1199_v35  ;;  %v1269_v37 = vsel %vm893_vm5, %v1253_v63, %v3350_v36 }
 0x17f   : > { %v1178_v61 = vpop.permute.xlu0 %1177  ;;  %v1322_v22 = vsel %vm1319_vm14, %v1308_v15, %v1199_v35  ;;  %v1281_v51 = vsel %vm1276_vm15, %v1269_v37, %v3350_v36 }
 0x180   : > { %v1289_v5 = vsel %vm1285_vm12, %v1278_v60, %v1178_v61  ;;  %v1334_v25 = vsel %vm1328_vm2, %v1322_v22, %v1225_v56  ;;  %v1295_v50 = vsel %vm1285_vm12, %v1281_v51, %v1184_v32 }
 0x181   : > { %v1306_v31 = vsel %vm1302_vm13, %v1289_v5, %v1197_v27 }
 0x182   : > { %v1321_v11 = vsel %vm1319_vm14, %v1306_v31, %v1197_v27  ;;  %v1188_v27 = vpop.permute.xlu1 %1187  ;;  %v2543_v31 = vcombine.low %v3450_v7, %v1702_v6 }
 0x183   : > { %v1182_v8 = vpop.permute.xlu0 %1181 }
 0x184   : > { %v1293_v10 = vsel %vm1285_vm12, %v1280_v28, %v1182_v8  ;;  %v1764_v28 = vshll.u32 %v2543_v31, 16 }
 0x185   : > { %v1310_v16 = vsel %vm1302_vm13, %v1293_v10, %v1201_v45 }
 0x186   : > { %v1323_v23 = vsel %vm1319_vm14, %v1310_v16, %v1201_v45  ;;  %v1257_v45 = vsel %vm874_vm4, %v3269_v17, %v1148_v19  ;;  %v1229_v53 = vpop.permute.xlu1 %1228  ;;  %v1766_v26 = vrot.slane %v1764_v28, 1 }
 0x187   : > { %v1223_v12 = vpop.permute.xlu0 %1222  ;;  %v1273_v14 = vsel %vm893_vm5, %v1257_v45, %v3352_v39 }
 0x188   : > { %v1332_v18 = vsel %vm1328_vm2, %v1321_v11, %v1223_v12  ;;  %v1283_v36 = vsel %vm1276_vm15, %v1273_v14, %v3352_v39  ;;  %v1720_v11 = vld [vmem:[#allocation3 + $0x4c] sm:$0x1]  ;;  %v2560_v12 = vcombine.low %v1719_v9, %v1719_v9 }
 0x189   : > { %v2506_v21 = vcombine.low %v1330_v46, %v1332_v18  ;;  %v1299_v56 = vsel %vm1285_vm12, %v1283_v36, %v1188_v27  ;;  %v1833_v46 = vrot.slane %v2543_v31, 1 }
 0x18a   : > { %v1316_v39 = vsel %vm1302_vm13, %v1299_v56, %v3358_v41  ;;  %v1233_v62 = vpop.permute.xlu1 %1232  ;;  %1943 = vrot.lane.b32.xlu0 %v2560_v12, %s2802_s19 }
 0x18b   : > { %2612 = vmatprep.mubr.msk.bf16.mxu0 %vm1385_vm3, %v2506_v21  ;;  %v1227_v24 = vpop.permute.xlu0 %1226  ;;  %v1326_v4 = vsel %vm1319_vm14, %v1316_v39, %v3358_v41  ;;  %v1762_v41 = vshrl.u32 %v2543_v31, 16  ;;  %v3464_v21 = vld [vmem:[%s3869_s5] ss:$0 sm:$0xff] }
 0x18c   : > { %v1336_v13 = vsel %vm1328_vm2, %v1323_v23, %v1227_v24  ;;  %v1342_v5 = vsel %vm1328_vm2, %v1326_v4, %v1233_v62  ;;  %v3469_v23 = vld [vmem:[%s3870_s6] ss:$0 sm:$0xff] }
 0x18d   : > { %v2507_v1 = vcombine.low %v1334_v25, %v1336_v13  ;;  %v1767_v10 = vor.u32 %v1766_v26, %v1762_v41 }
 0x18f   : > { %2613 = vmatmul.mubr.msk.bf16.vlgmr.msra.gmra.mrb[0].mxu0 %vm1385_vm3, %v2507_v1  ;;  %v1146_v33 = vpop.permute.xlu0 %1145  ;;  %1817 = vrot.lane.b32.xlu1 %v1767_v10, %s2799_s29 }
 0x190   : > { %v1255_v35 = vsel %vm874_vm4, %v3277_v43, %v1146_v33 }
 0x191   : > { %v1271_v42 = vsel %vm893_vm5, %v1255_v35, %v3360_v48 }
 0x192   : > { %v1282_v43 = vsel %vm1276_vm15, %v1271_v42, %v3360_v48 }
 0x193   : > { %v1150_v2 = vpop.permute.xlu0 %1149  ;;  %1841 = vrot.lane.b32.xlu1 %v1833_v46, %s2803_s20 }
 0x194   : > { %v1259_v3 = vsel %vm874_vm4, %v3283_v29, %v1150_v2  ;;  %v1312_v29 = vsel %vm1302_vm13, %v1295_v50, %v3354_v30 }
 0x195   : > { %v1275_v52 = vsel %vm893_vm5, %v1259_v3, %v3362_v40  ;;  %v1324_v0 = vsel %vm1319_vm14, %v1312_v29, %v3354_v30 }
 0x196   : > { %v1284_v54 = vsel %vm1276_vm15, %v1275_v52, %v3362_v40  ;;  %v1338_v44 = vsel %vm1328_vm2, %v1324_v0, %v1229_v53 }
 0x197   : > { %v1186_v49 = vpop.permute.xlu0 %1185 }
 0x198   : > { %v1297_v17 = vsel %vm1285_vm12, %v1282_v43, %v1186_v49 }
 0x199   : > { %v1314_v48 = vsel %vm1302_vm13, %v1297_v17, %v3364_v34 }
 0x19a   : > { %v1325_v55 = vsel %vm1319_vm14, %v1314_v48, %v3364_v34 }
 0x19b   : > { %v1190_v58 = vpop.permute.xlu0 %1189 }
 0x19c   : > { %v1301_v59 = vsel %vm1285_vm12, %v1284_v54, %v1190_v58  ;;  %vm1618_vm12 = vsmask.f32 4352 }
 0x19d   : > { %v1318_v60 = vsel %vm1302_vm13, %v1301_v59, %v3356_v38 }
 0x19e   : > { %v1327_v30 = vsel %vm1319_vm14, %v1318_v60, %v3356_v38  ;;  %v3453_v38 = vcombine.low %v1719_v9, %v1720_v11  ;;  %vm3479_vm14 = vmand %vm1617_vm8, %vm1618_vm12 }
 0x19f   : > { %v1231_v61 = vpop.permute.xlu0 %1230 }
 0x1a0   : > { %v1340_v40 = vsel %vm1328_vm2, %v1325_v55, %v1231_v61  ;;  %v1951_v15 = vshll.u32 %v3453_v38, 16  ;;  %v1949_v16 = vshrl.u32 %v3453_v38, 16 }
 0x1a1   : > { %v2508_v20 = vcombine.low %v1338_v44, %v1340_v40 }
 0x1a2   : > { %v1953_v18 = vrot.slane %v1951_v15, 1 }
 0x1a3   : > { %2616 = vmatprep.mubr.msk.bf16.mxu0 %vm1385_vm3, %v2508_v20  ;;  %v1235_v34 = vpop.permute.xlu0 %1234 }
 0x1a4   : > { %v1344_v57 = vsel %vm1328_vm2, %v1327_v30, %v1235_v34  ;;  %v1954_v19 = vor.u32 %v1953_v18, %v1949_v16 }
 0x1a5   : > { %v2509_v8 = vcombine.low %v1342_v5, %v1344_v57 }
 0x1a6   : > { %1969 = vrot.lane.b32.xlu0 %v1954_v19, %s2804_s21 }
 0x1a7   : > { %2617 = vmatmul.mubr.msk.bf16.gmra.mrb[4].mxu0 %vm1385_vm3, %v2509_v8 }
 0x262   : > { %v2614_v22 = vpop.f32.mrb[0].mxu0 }
 0x263   : > { %v1476_v24 = vmul.f32 %v2614_v22, %v3464_v21  ;;  %v1436_v25 = vpop.f32.mrb[1].mxu0 }
 0x264   : > { %v1474_v13 = vmul.f32 %v3464_v21, %v1436_v25  ;;  %v2615_v1 = vpop.f32.mrb[2].mxu0 }
 0x265   : > { %v1491_v32 = vadd.f32 %v3469_v23, %v1476_v24  ;;  %v1477_v33 = vmul.f32 %v2615_v1, %v3464_v21  ;;  %v1439_v63 = vpop.f32.mrb[3].mxu0 }
 0x266   : > { %v1489_v35 = vadd.f32 %v3469_v23, %v1474_v13  ;;  %v1475_v2 = vmul.f32 %v3464_v21, %v1439_v63 }
 0x267   : > { %vm1499_vm5 = vcmp.ge.f32.partialorder %v1491_v32, 0.0  ;;  %v1507_v37 = vmul.f32 0.1, %v1491_v32  ;;  %v1492_v27 = vadd.f32 %v3469_v23, %v1477_v33 }
 0x268   : > { %vm1497_vm9 = vcmp.ge.f32.partialorder %v1489_v35, 0.0  ;;  %v1505_v42 = vmul.f32 0.1, %v1489_v35  ;;  %v1490_v45 = vadd.f32 %v3469_v23, %v1475_v2 }
 0x269   : > { %v1515_v3 = vsel %vm1499_vm5, %v1491_v32, %v1507_v37  ;;  %vm1500_vm10 = vcmp.ge.f32.partialorder %v1492_v27, 0.0  ;;  %v1508_v49 = vmul.f32 0.1, %v1492_v27 }
 0x26a   : > { %v2583_v51 = vpack.c.bf16 %v1515_v3, %v1515_v3  ;;  %v1513_v43 = vsel %vm1497_vm9, %v1489_v35, %v1505_v42  ;;  %vm1498_vm11 = vcmp.ge.f32.partialorder %v1490_v45, 0.0  ;;  %v1506_v14 = vmul.f32 0.1, %v1490_v45 }
 0x26b   : > { %v2581_v50 = vpack.c.bf16 %v1513_v43, %v1513_v43  ;;  %v1516_v52 = vsel %vm1500_vm10, %v1492_v27, %v1508_v49 }
 0x26c   : > { %v1560_v17 = vshrl.u32 %v2583_v51, 16  ;;  %v2584_v53 = vpack.c.bf16 %v1516_v52, %v1516_v52  ;;  %v1514_v58 = vsel %vm1498_vm11, %v1490_v45, %v1506_v14  ;;  %v1563_v54 = vshll.u32 %v2583_v51, 16 }
 0x26d   : > { %v1546_v29 = vshrl.u32 %v2581_v50, 16  ;;  %v2582_v36 = vpack.c.bf16 %v1514_v58, %v1514_v58  ;;  %v1549_v0 = vshll.u32 %v2581_v50, 16  ;;  %vm2184_vm11 = vcmask 588800  }
 0x26e   : > { %v1562_v48 = vrot.slane %v1560_v17, 7  ;;  %v1567_v56 = vshrl.u32 %v2584_v53, 16  ;;  %v1570_v60 = vshll.u32 %v2584_v53, 16 }
 0x26f   : > { %v1548_v59 = vrot.slane %v1546_v29, 7  ;;  %v1553_v55 = vshrl.u32 %v2582_v36, 16  ;;  %v1556_v20 = vshll.u32 %v2582_v36, 16 }
 0x270   : > { %v1565_v61 = vor.u32 %v1563_v54, %v1562_v48  ;;  %v1569_v44 = vrot.slane %v1567_v56, 7 }
 0x271   : > { %v1551_v40 = vor.u32 %v1549_v0, %v1548_v59  ;;  %v1555_v62 = vrot.slane %v1553_v55, 7 }
 0x272   : > { %v1611_v4 = vsel %vm3003_vm7, 0, %v1565_v61  ;;  %v1572_v30 = vor.u32 %v1570_v60, %v1569_v44 }
 0x273   : > { %v1622_v34 = vsel %vm3479_vm14, %v1611_v4, 0  ;;  %v1609_v5 = vsel %vm3003_vm7, 0, %v1551_v40  ;;  %v1558_v57 = vor.u32 %v1556_v20, %v1555_v62 }
 0x274   : > { %v2531_v8 = vcombine.low %v1622_v34, %v1622_v34  ;;  %v2532_v6 = vcombine.high %v1622_v34, %v1622_v34  ;;  %v1620_v31 = vsel %vm3479_vm14, %v1609_v5, 0  ;;  %v1612_v28 = vsel %vm3003_vm7, 0, %v1572_v30 }
 0x275   : > { %v2527_v41 = vcombine.low %v1620_v31, %v1620_v31  ;;  %v2528_v26 = vcombine.high %v1620_v31, %v1620_v31  ;;  %v1623_v10 = vsel %vm3479_vm14, %v1612_v28, 0  ;;  %v1610_v9 = vsel %vm3003_vm7, 0, %v1558_v57 }
 0x276   : > { %1689 = vst.msk [vmem:[#allocation3 + $0x18] sm:$0xf] %vm1014_vm0, %v2531_v8  ;;  %v2533_v11 = vcombine.low %v1623_v10, %v1623_v10  ;;  %v2534_v12 = vcombine.high %v1623_v10, %v1623_v10  ;;  %v1621_v15 = vsel %vm3479_vm14, %v1610_v9, 0 }
 0x277   : > { %1690 = vst.msk [vmem:[#allocation3 + $0x1c] sm:$0x1] %vm1016_vm1, %v2532_v6  ;;  %1686 = vst.msk [vmem:[#allocation3 + $0xc] sm:$0x1] %vm1016_vm1, %v2528_v26  ;;  %v2529_v46 = vcombine.low %v1621_v15, %v1621_v15  ;;  %v2530_v16 = vcombine.high %v1621_v15, %v1621_v15 }
 0x278   : > { %1685 = vst.msk [vmem:[#allocation3 + $0x8] sm:$0xf] %vm1014_vm0, %v2527_v41  ;;  %1691 = vst.msk [vmem:[#allocation3 + $0x20] sm:$0xf] %vm1014_vm0, %v2533_v11 }
 0x279   : > { %1692 = vst.msk [vmem:[#allocation3 + $0x24] sm:$0x1] %vm1016_vm1, %v2534_v12  ;;  %1688 = vst.msk [vmem:[#allocation3 + $0x14] sm:$0x1] %vm1016_vm1, %v2530_v16 }
 0x27a   : > { %1687 = vst.msk [vmem:[#allocation3 + $0x10] sm:$0xf] %vm1014_vm0, %v2529_v46  ;;  %v2618_v18 = vpop.f32.mrb[4].mxu0 }
 0x27b   : > { %v1480_v19 = vmul.f32 %v2618_v18, %v3464_v21  ;;  %v1452_v22 = vpop.f32.mrb[5].mxu0 }
 0x27c   : > { %v1478_v24 = vmul.f32 %v3464_v21, %v1452_v22  ;;  %v2619_v25 = vpop.f32.mrb[6].mxu0 }
 0x27d   : > { %v1495_v13 = vadd.f32 %v3469_v23, %v1480_v19  ;;  %v1481_v1 = vmul.f32 %v2619_v25, %v3464_v21  ;;  %v1455_v32 = vpop.f32.mrb[7].mxu0  ;;  %v3511_v33 = vld [vmem:[#allocation3 + $0x18] sm:$0xf] }
 0x27e   : > { %v1708_v63 = vld [vmem:[#allocation3 + $0x1c] sm:$0x1]  ;;  %v1493_v35 = vadd.f32 %v3469_v23, %v1478_v24  ;;  %v1479_v2 = vmul.f32 %v3464_v21, %v1455_v32  ;;  %v2553_v37 = vcombine.low %v3511_v33, %v3511_v33  ;;  %v1704_v20 = vld [vmem:[#allocation3 + $0xc] sm:$0x1] }
 0x27f   : > { %v3518_v27 = vcombine.low %v3511_v33, %v1708_v63  ;;  %v3520_v42 = vld [vmem:[#allocation3 + $0x8] sm:$0xf]  ;;  %vm1503_vm3 = vcmp.ge.f32.partialorder %v1495_v13, 0.0  ;;  %v1511_v45 = vmul.f32 0.1, %v1495_v13  ;;  %v1496_v3 = vadd.f32 %v3469_v23, %v1481_v1 }
 0x280   : > { %vm1501_vm5 = vcmp.ge.f32.partialorder %v1493_v35, 0.0  ;;  %v1509_v49 = vmul.f32 0.1, %v1493_v35  ;;  %v1494_v51 = vadd.f32 %v3469_v23, %v1479_v2  ;;  %1931 = vrot.lane.b32.xlu0 %v2553_v37, %s2802_s19  ;;  %1871 = vrot.lane.b32.xlu1 %v2553_v37, %s2800_s8  ;;  %v2551_v21 = vcombine.low %v3520_v42, %v3520_v42  ;;  %v3529_v36 = vld [vmem:[#allocation3 + $0x20] sm:$0xf] }
 0x281   : > { %v1519_v43 = vsel %vm1503_vm3, %v1495_v13, %v1511_v45  ;;  %vm1504_vm9 = vcmp.ge.f32.partialorder %v1496_v3, 0.0  ;;  %v1512_v14 = vmul.f32 0.1, %v1496_v3  ;;  %v1836_v50 = vrot.slane %v3518_v27, 1  ;;  %v3560_v63 = vld [vmem:[#allocation3 + $0x10] sm:$0xf] }
 0x282   : > { %v2587_v52 = vpack.c.bf16 %v1519_v43, %v1519_v43  ;;  %v1517_v17 = vsel %vm1501_vm5, %v1493_v35, %v1509_v49  ;;  %vm1502_vm10 = vcmp.ge.f32.partialorder %v1494_v51, 0.0  ;;  %v1510_v53 = vmul.f32 0.1, %v1494_v51  ;;  %v1710_v47 = vld [vmem:[#allocation3 + $0x24] sm:$0x1] }
 0x283   : > { %v2585_v58 = vpack.c.bf16 %v1517_v17, %v1517_v17  ;;  %v1520_v29 = vsel %vm1504_vm9, %v1496_v3, %v1512_v14  ;;  %v2554_v44 = vcombine.low %v3529_v36, %v3529_v36  ;;  %v2544_v28 = vcombine.low %v3520_v42, %v1704_v20  ;;  %v1706_v2 = vld [vmem:[#allocation3 + $0x14] sm:$0x1] }
 0x284   : > { %v1588_v23 = vshrl.u32 %v2587_v52, 16  ;;  %v2588_v48 = vpack.c.bf16 %v1520_v29, %v1520_v29  ;;  %v1518_v54 = vsel %vm1502_vm10, %v1494_v51, %v1510_v53  ;;  %1847 = vrot.lane.b32.xlu0 %v1836_v50, %s2803_s20  ;;  %1867 = vrot.lane.b32.xlu1 %v2551_v21, %s2800_s8  ;;  %v1591_v55 = vshll.u32 %v2587_v52, 16 }
 0x285   : > { %v1574_v56 = vshrl.u32 %v2585_v58, 16  ;;  %v2586_v59 = vpack.c.bf16 %v1518_v54, %v1518_v54  ;;  %v1577_v40 = vshll.u32 %v2585_v58, 16  ;;  %v1834_v13 = vrot.slane %v2544_v28, 1 }
 0x286   : > { %v1590_v0 = vrot.slane %v1588_v23, 7  ;;  %v1595_v61 = vshrl.u32 %v2588_v48, 16  ;;  %v1598_v34 = vshll.u32 %v2588_v48, 16  ;;  %v2552_v39 = vcombine.low %v3560_v63, %v3560_v63 }
 0x287   : > { %v1576_v60 = vrot.slane %v1574_v56, 7  ;;  %v1581_v62 = vshrl.u32 %v2586_v59, 16  ;;  %v1584_v8 = vshll.u32 %v2586_v59, 16  ;;  %v2547_v35 = vcombine.low %v3529_v36, %v1710_v47 }
 0x288   : > { %v1593_v4 = vor.u32 %v1591_v55, %v1590_v0  ;;  %v1597_v30 = vrot.slane %v1595_v61, 7  ;;  %1914 = vrot.lane.b32.xlu1 %v1836_v50, %s2805_s13  ;;  %1873 = vrot.lane.b32.xlu0 %v2554_v44, %s2800_s8  ;;  %v2545_v45 = vcombine.low %v3560_v63, %v1706_v2  ;;  %v1785_v3 = vshll.u32 %v3518_v27, 16 }
 0x289   : > { %v1579_v5 = vor.u32 %v1577_v40, %v1576_v60  ;;  %v1583_v57 = vrot.slane %v1581_v62, 7  ;;  %v1837_v37 = vrot.slane %v2547_v35, 1  ;;  %v1783_v21 = vshrl.u32 %v3518_v27, 16 }
 0x28a   : > { %v1615_v6 = vsel %vm3003_vm7, 0, %v1593_v4  ;;  %v1600_v31 = vor.u32 %v1598_v34, %v1597_v30  ;;  %v1835_v49 = vrot.slane %v2545_v45, 1  ;;  %v1787_v51 = vrot.slane %v1785_v3, 1  ;;  %v3654_v3 = vpop.permute.xlu1 %1817 }
 0x28b   : > { %v1626_v41 = vsel %vm3479_vm14, %v1615_v6, 0  ;;  %v1613_v26 = vsel %vm3003_vm7, 0, %v1579_v5  ;;  %v1586_v10 = vor.u32 %v1584_v8, %v1583_v57  ;;  %v1771_v14 = vshll.u32 %v2544_v28, 16  ;;  %v2727_v5 = vld [vmem:[%s3866_s2] sm:$0xff]   ;;  %v2728_v57 = vld [vmem:[%s3866_s2 + $0x8] sm:$0xff]  }
 0x28c   : > { %v2539_v9 = vcombine.low %v1626_v41, %v1626_v41  ;;  %v2540_v11 = vcombine.high %v1626_v41, %v1626_v41  ;;  %v1624_v12 = vsel %vm3479_vm14, %v1613_v26, 0  ;;  %v1616_v15 = vsel %vm3003_vm7, 0, %v1600_v31  ;;  %1933 = vrot.lane.b32.xlu1 %v2554_v44, %s2802_s19  ;;  %1974 = vrot.lane.b32.xlu0 %v1836_v50, %s2806_s16  ;;  %v2729_v26 = vld [vmem:[%s3866_s2 + $0x10] sm:$0xff]  }
 0x28d   : > { %v2535_v46 = vcombine.low %v1624_v12, %v1624_v12  ;;  %v2536_v16 = vcombine.high %v1624_v12, %v1624_v12  ;;  %v1627_v18 = vsel %vm3479_vm14, %v1616_v15, 0  ;;  %v1614_v19 = vsel %vm3003_vm7, 0, %v1586_v10  ;;  %2620 = vmatprep.subr.bf16.mxu1 %v2727_v5  ;;  %v2730_v12 = vld [vmem:[%s3866_s2 + $0x18] sm:$0xff]  }
 0x28e   : > { %1697 = vst.msk [vmem:[#allocation3 + $0x38] sm:$0xf] %vm1014_vm0, %v2539_v9  ;;  %v2541_v22 = vcombine.low %v1627_v18, %v1627_v18  ;;  %v2542_v24 = vcombine.high %v1627_v18, %v1627_v18  ;;  %v1625_v25 = vsel %vm3479_vm14, %v1614_v19, 0  ;;  %v1788_v43 = vor.u32 %v1787_v51, %v1783_v21  ;;  %2621 = vmatpush3.bf16.msra.mxu1 %v2727_v5  ;;  %v2731_v18 = vld [vmem:[%s3866_s2 + $0x20] ss:$0 sps:$4 sm:$0xff]  }
 0x28f   : > { %1698 = vst.msk [vmem:[#allocation3 + $0x3c] sm:$0x1] %vm1016_vm1, %v2540_v11  ;;  %1694 = vst.msk [vmem:[#allocation3 + $0x2c] sm:$0x1] %vm1016_vm1, %v2536_v16  ;;  %v2537_v1 = vcombine.low %v1625_v25, %v1625_v25  ;;  %v2538_v32 = vcombine.high %v1625_v25, %v1625_v25  ;;  %v1773_v50 = vrot.slane %v1771_v14, 1  ;;  %v1792_v52 = vshll.u32 %v2547_v35, 16  ;;  %2622 = vmatprep.subr.bf16.mxu1 %v2728_v57 }
 0x290   : > { %1693 = vst.msk [vmem:[#allocation3 + $0x28] sm:$0xf] %vm1014_vm0, %v2535_v46  ;;  %1699 = vst.msk [vmem:[#allocation3 + $0x40] sm:$0xf] %vm1014_vm0, %v2541_v22  ;;  %1910 = vrot.lane.b32.xlu1 %v1834_v13, %s2805_s13  ;;  %1843 = vrot.lane.b32.xlu0 %v1834_v13, %s2803_s20  ;;  %v1769_v17 = vshrl.u32 %v2544_v28, 16  ;;  %v1790_v27 = vshrl.u32 %v2547_v35, 16 }
 0x291   : > { %1700 = vst.msk [vmem:[#allocation3 + $0x44] sm:$0x1] %vm1016_vm1, %v2542_v24  ;;  %1696 = vst.msk [vmem:[#allocation3 + $0x34] sm:$0x1] %vm1016_vm1, %v2538_v32  ;;  %v1794_v58 = vrot.slane %v1792_v52, 1  ;;  %v1778_v23 = vshll.u32 %v2545_v45, 16 }
 0x292   : > { %1695 = vst.msk [vmem:[#allocation3 + $0x30] sm:$0xf] %vm1014_vm0, %v2537_v1  ;;  %v1774_v53 = vor.u32 %v1773_v50, %v1769_v17  ;;  %v1776_v59 = vshrl.u32 %v2545_v45, 16  ;;  %2623 = vmatpush3.bf16.msra.mxu1 %v2728_v57  ;;  %v2198_v24 = vsel %vm647_vm6, %v2731_v18, 0  ;;  %v1971_v14 = vrot.slane %v3453_v38, 1  ;;  %v2265_v17 = vld [vmem:[#allocation4] sm:$0xff] }
 0x293   : > { %v1795_v29 = vor.u32 %v1794_v58, %v1790_v27  ;;  %v1780_v56 = vrot.slane %v1778_v23, 1  ;;  %2624 = vmatprep.subr.bf16.mxu1 %v2729_v26  ;;  %v2268_v23 = vld [vmem:[#allocation4 + $0x18] sm:$0xff]  ;;  %vm2060_vm0 = vcmask 326656   ;;  %vm2077_vm1 = vcmask 392192  }
 0x294   : > { %1929 = vrot.lane.b32.xlu1 %v2552_v39, %s2802_s19  ;;  %1869 = vrot.lane.b32.xlu0 %v2552_v39, %s2800_s8  ;;  %vm2111_vm7 = vcmask 523264  }
 0x295   : > { %v3586_v48 = vld [vmem:[#allocation3 + $0x38] sm:$0xf]  ;;  %v1781_v0 = vor.u32 %v1780_v56, %v1776_v59  ;;  %v2269_v56 = vld [vmem:[#allocation4 + $0x20] sm:$0xff] }
 0x296   : > { %v2557_v54 = vcombine.low %v3586_v48, %v3586_v48  ;;  %v1716_v55 = vld [vmem:[#allocation3 + $0x3c] sm:$0x1]  ;;  %v1712_v20 = vld [vmem:[#allocation3 + $0x2c] sm:$0x1]  ;;  %2625 = vmatpush3.bf16.msra.mxu1 %v2729_v26 }
 0x297   : > { %v3594_v61 = vld [vmem:[#allocation3 + $0x28] sm:$0xf]  ;;  %v2550_v44 = vcombine.low %v3586_v48, %v1716_v55  ;;  %v1717_v62 = vld [vmem:[#allocation3 + $0x40] sm:$0xf]  ;;  %2626 = vmatprep.subr.bf16.mxu1 %v2730_v12  ;;  %v2270_v59 = vld [vmem:[#allocation4 + $0x28] sm:$0xff] }
 0x298   : > { %1976 = vrot.lane.b32.xlu1 %v1837_v37, %s2806_s16  ;;  %1916 = vrot.lane.b32.xlu0 %v1837_v37, %s2805_s13  ;;  %v2555_v60 = vcombine.low %v3594_v61, %v3594_v61  ;;  %v2558_v4 = vcombine.low %v1717_v62, %v1717_v62  ;;  %v2548_v30 = vcombine.low %v3594_v61, %v1712_v20  ;;  %v1718_v8 = vld [vmem:[#allocation3 + $0x44] sm:$0x1]  ;;  %v1714_v41 = vld [vmem:[#allocation3 + $0x34] sm:$0x1] }
 0x299   : > { %v3603_v40 = vrot.slane %v2550_v44, 1  ;;  %v3619_v6 = vld [vmem:[#allocation3 + $0x30] sm:$0xf]  ;;  %v2559_v31 = vcombine.low %v1717_v62, %v1718_v8  ;;  %v1813_v11 = vshll.u32 %v2550_v44, 16  ;;  %v1811_v16 = vshrl.u32 %v2550_v44, 16  ;;  %v2271_v44 = vld [vmem:[#allocation4 + $0x30] sm:$0xff] }
 0x29a   : > { %v1838_v34 = vrot.slane %v2548_v30, 1  ;;  %v2556_v28 = vcombine.low %v3619_v6, %v3619_v6  ;;  %v2549_v9 = vcombine.low %v3619_v6, %v1714_v41  ;;  %2627 = vmatpush3.bf16.msra.mxu1 %v2730_v12  ;;  %v1799_v22 = vshll.u32 %v2548_v30, 16 }
 0x29b   : > { %v1909_v10 = vrot.slane %v2559_v31, 1  ;;  %v1815_v46 = vrot.slane %v1813_v11, 1  ;;  %2639 = vmatprep.subr.msk.bf16.mxu1 %vm647_vm6, %v2731_v18  ;;  %v1797_v13 = vshrl.u32 %v2548_v30, 16  ;;  %v1889_v32 = vshll.u32 %v2559_v31, 16 }
 0x29c   : > { %1849 = vrot.lane.b32.xlu1 %v1837_v37, %s2803_s20  ;;  %1912 = vrot.lane.b32.xlu0 %v1835_v49, %s2805_s13  ;;  %v1839_v15 = vrot.slane %v2549_v9, 1  ;;  %v1801_v25 = vrot.slane %v1799_v22, 1  ;;  %v1806_v39 = vshll.u32 %v2549_v9, 16  ;;  %v1887_v35 = vshrl.u32 %v2559_v31, 16  ;;  %v3652_v37 = vpop.permute.xlu0 %1943 }
 0x29d   : > { %v1816_v19 = vor.u32 %v1815_v46, %v1811_v16  ;;  %v1891_v47 = vrot.slane %v1889_v32, 1  ;;  %vm2094_vm6 = vcmask 457728  }
 0x29e   : > { %2629 = vmatpush3.bf16.msra.mxu1 %v2198_v24  ;;  %v1802_v1 = vor.u32 %v1801_v25, %v1797_v13  ;;  %v1808_v45 = vrot.slane %v1806_v39, 1 }
 0x29f   : > { %v1892_v2 = vor.u32 %v1891_v47, %v1887_v35 }
 0x2a0   : > { %1823 = vrot.lane.b32.xlu0 %v1788_v43, %s2799_s29  ;;  %1845 = vrot.lane.b32.xlu1 %v1835_v49, %s2803_s20  ;;  %v3660_v21 = vpop.permute.xlu0 %1969 }
 0x2a4   : > { %1957 = vrot.lane.b32.xlu0 %v1788_v43, %s2804_s21  ;;  %1972 = vrot.lane.b32.xlu1 %v1835_v49, %s2806_s16  ;;  %v1804_v49 = vshrl.u32 %v2549_v9, 16 }
 0x2a6   : > { %v1809_v51 = vor.u32 %v1808_v45, %v1804_v49 }
 0x2a8   : > { %1819 = vrot.lane.b32.xlu0 %v1774_v53, %s2799_s29  ;;  %1897 = vrot.lane.b32.xlu1 %v1788_v43, %s2801_s9  ;;  %v3662_v43 = vpop.permute.xlu1 %1841 }
 0x2ac   : > { %1899 = vrot.lane.b32.xlu0 %v1795_v29, %s2801_s9  ;;  %1893 = vrot.lane.b32.xlu1 %v1774_v53, %s2801_s9  ;;  %v2266_v53 = vld [vmem:[#allocation4 + $0x8] sm:$0xff] }
 0x2b0   : > { %1959 = vrot.lane.b32.xlu1 %v1795_v29, %s2804_s21  ;;  %1939 = vrot.lane.b32.xlu0 %v2557_v54, %s2802_s19 }
 0x2b4   : > { %1825 = vrot.lane.b32.xlu1 %v1795_v29, %s2799_s29  ;;  %1895 = vrot.lane.b32.xlu0 %v1781_v0, %s2801_s9  ;;  %v2267_v29 = vld [vmem:[#allocation4 + $0x10] sm:$0xff] }
 0x2b8   : > { %1879 = vrot.lane.b32.xlu1 %v2557_v54, %s2800_s8  ;;  %1935 = vrot.lane.b32.xlu0 %v2555_v60, %s2802_s19 }
 0x2bc   : > { %1821 = vrot.lane.b32.xlu1 %v1781_v0, %s2799_s29  ;;  %1855 = vrot.lane.b32.xlu0 %v3603_v40, %s2803_s20 }
 0x2c0   : > { %1955 = vrot.lane.b32.xlu1 %v1781_v0, %s2804_s21  ;;  %1881 = vrot.lane.b32.xlu0 %v2558_v4, %s2800_s8 }
 0x2c4   : > { %1875 = vrot.lane.b32.xlu1 %v2555_v60, %s2800_s8  ;;  %1978 = vrot.lane.b32.xlu0 %v1838_v34, %s2806_s16  ;;  %v2272_v60 = vld [vmem:[#allocation4 + $0x38] sm:$0xff] }
 0x2c8   : > { %1922 = vrot.lane.b32.xlu1 %v3603_v40, %s2805_s13  ;;  %1851 = vrot.lane.b32.xlu0 %v1838_v34, %s2803_s20 }
 0x2cc   : > { %1941 = vrot.lane.b32.xlu1 %v2558_v4, %s2802_s19  ;;  %1877 = vrot.lane.b32.xlu0 %v2556_v28, %s2800_s8  ;;  %s2736_s8 = sshll.u32 %s2808_s18, 4  ;;  %s2737_s8 = int_to_ptr.vmem [resolvable:$false] %s2736_s8 }
 0x2cd   : > { %s2738_s22 = scalar_lea.vmem %s2737_s8, 2048 }
 0x2d0   : > { %1918 = vrot.lane.b32.xlu1 %v1838_v34, %s2805_s13  ;;  %1924 = vrot.lane.b32.xlu0 %v1909_v10, %s2805_s13 }
 0x2d4   : > { %1937 = vrot.lane.b32.xlu1 %v2556_v28, %s2802_s19  ;;  %1920 = vrot.lane.b32.xlu0 %v1839_v15, %s2805_s13  ;;  %s269_s19 = sand.u32 1, %s2786_s25   ;;  %s2589_s13 = sshll.u32 %s2871_s28, 10 }
 0x2d5   : > { %s3810_s28 = scalar_lea.hbm %s3871_s7, %s2589_s13  ;;  %s3822_s15 = scalar_lea.sflag [#allocation6], %s269_s19 }
 0x2d8   : > { %1831 = vrot.lane.b32.xlu0 %v1816_v19, %s2799_s29  ;;  %1853 = vrot.lane.b32.xlu1 %v1839_v15, %s2803_s20  ;;  %s2434_s20 = sshll.u32 %s269_s19, 6 }
 0x2dc   : > { %1965 = vrot.lane.b32.xlu0 %v1816_v19, %s2804_s21  ;;  %1980 = vrot.lane.b32.xlu1 %v1839_v15, %s2806_s16 }
 0x2e0   : > { %1961 = vrot.lane.b32.xlu0 %v1802_v1, %s2804_s21  ;;  %1905 = vrot.lane.b32.xlu1 %v1816_v19, %s2801_s9 }
 0x2e4   : > { %1827 = vrot.lane.b32.xlu0 %v1802_v1, %s2799_s29  ;;  %1901 = vrot.lane.b32.xlu1 %v1802_v1, %s2801_s9  ;;  %v1990_v1 = vsel %vm874_vm4, %v3450_v7, %v3654_v3 }
 0x2e5   : > { %v2013_v39 = vsel %vm1276_vm15, %v1990_v1, %v3662_v43 }
 0x2e8   : > { %1907 = vrot.lane.b32.xlu0 %v1892_v2, %s2801_s9  ;;  %1967 = vrot.lane.b32.xlu1 %v1892_v2, %s2804_s21 }
 0x2ec   : > { %1903 = vrot.lane.b32.xlu0 %v1809_v51, %s2801_s9  ;;  %1829 = vrot.lane.b32.xlu1 %v1809_v51, %s2799_s29  ;;  %s2807_s9 = smov 2  }
 0x2f0   : > { %1982 = vrot.lane.b32.xlu0 %v3603_v40, %s2806_s16  ;;  %1963 = vrot.lane.b32.xlu1 %v1809_v51, %s2804_s21  ;;  %s3785_s21 = scalar_lea.vmem [#allocation5], %s2434_s20 }
 0x2f2   : > { %v3668_v50 = vpop.permute.xlu1 %1871  ;;  %v3670_v52 = vpop.permute.xlu0 %1931 }
 0x2f4   : > { %1986 = vrot.lane.b32.xlu0 %v1971_v14, %s2806_s16  ;;  %1984 = vrot.lane.b32.xlu1 %v1909_v10, %s2806_s16  ;;  %s2353_s16 = sshll.u32 %s3785_s21, 4  ;;  %s3814_s16 = int_to_ptr.vmem [resolvable:$true] %s2353_s16 }
 0x2f5   : > { %s2732_s17 = scalar_lea.vmem %s3814_s16, 1024  ;;  %p2739_p0 = scmp.lt.s32.totalorder %s3814_s16, %s2737_s8 }
 0x2f6   : > { %v1868_v58 = vpop.permute.xlu1 %1867  ;;  %v1848_v27 = vpop.permute.xlu0 %1847  ;;  %p2733_p11 = scmp.ne.s32.totalorder %s3814_s16, %s2732_s17  ;;  %p2740_p1 = scmp.lt.s32.totalorder %s2738_s22, %s2732_s17 }
 0x2f7   : > { %v2029_v2 = vsel %vm1302_vm13, %v2013_v39, %v1868_v58 }
 0x2f8   : > { %2281 = vrot.lane.b32.xlu1 %v2265_v17, %s2807_s9  ;;  %2283 = vrot.lane.b32.xlu0 %v2266_v53, %s2807_s9  ;;  %p2734_p12 = pnand %p2733_p11, %p2888_p5  ;;  %p2741_p2 = por %p2740_p1, %p2739_p0 }
 0x2fa   : > { %v3674_v54 = vpop.permute.xlu1 %1914  ;;  %v1874_v38 = vpop.permute.xlu0 %1873  ;;  %p2735_p13 = pneg %p2734_p12 }
 0x2fc   : > { %2285 = vrot.lane.b32.xlu1 %v2267_v29, %s2807_s9  ;;  %2287 = vrot.lane.b32.xlu0 %v2268_v23, %s2807_s9  ;;  %p2742_p3 = pnand %p2741_p2, %p2735_p13 }
 0x2fe   : > { %v3676_v0 = vpop.permute.xlu1 %1933  ;;  %v3678_v55 = vpop.permute.xlu0 %1974 }
 0x300   : > { %2289 = vrot.lane.b32.xlu1 %v2269_v56, %s2807_s9  ;;  %2291 = vrot.lane.b32.xlu0 %v2270_v59, %s2807_s9 }
 0x302   : > { %v1911_v40 = vpop.permute.xlu1 %1910  ;;  %v1844_v62 = vpop.permute.xlu0 %1843 }
 0x304   : > { %2293 = vrot.lane.b32.xlu1 %v2271_v44, %s2807_s9  ;;  %2295 = vrot.lane.b32.xlu0 %v2272_v60, %s2807_s9 }
 0x306   : > { %v1930_v20 = vpop.permute.xlu1 %1929  ;;  %v1870_v4 = vpop.permute.xlu0 %1869 }
 0x30a   : > { %v1977_v30 = vpop.permute.xlu1 %1976  ;;  %v1917_v34 = vpop.permute.xlu0 %1916 }
 0x30e   : > { %v3680_v5 = vpop.permute.xlu1 %1849  ;;  %v1913_v57 = vpop.permute.xlu0 %1912 }
 0x312   : > { %v1846_v8 = vpop.permute.xlu1 %1845  ;;  %v1824_v31 = vpop.permute.xlu0 %1823 }
 0x313   : > { %v1999_v28 = vsel %vm874_vm4, %v3511_v33, %v1824_v31 }
 0x314   : > { %v2019_v41 = vsel %vm1276_vm15, %v1999_v28, %v1848_v27 }
 0x315   : > { %v2035_v26 = vsel %vm1302_vm13, %v2019_v41, %v1874_v38 }
 0x316   : > { %v1973_v10 = vpop.permute.xlu1 %1972  ;;  %v1958_v9 = vpop.permute.xlu0 %1957 }
 0x31a   : > { %v1898_v11 = vpop.permute.xlu1 %1897  ;;  %v1820_v12 = vpop.permute.xlu0 %1819 }
 0x31b   : > { %v1993_v19 = vsel %vm874_vm4, %v3520_v42, %v1820_v12 }
 0x31c   : > { %v2015_v24 = vsel %vm1276_vm15, %v1993_v19, %v1844_v62 }
 0x31d   : > { %v2031_v32 = vsel %vm1302_vm13, %v2015_v24, %v1870_v4 }
 0x31e   : > { %v1894_v15 = vpop.permute.xlu1 %1893  ;;  %v1900_v46 = vpop.permute.xlu0 %1899 }
 0x31f   : > { %v2051_v16 = vsel %vm1328_vm2, %v2035_v26, %v1900_v46  ;;  %v2045_v49 = vsel %vm1328_vm2, %v2029_v2, %v1894_v15 }
 0x320   : > { %v2068_v18 = vsel %vm2060_vm0, %v2051_v16, %v1917_v34  ;;  %v2062_v14 = vsel %vm2060_vm0, %v2045_v49, %v1911_v40 }
 0x322   : > { %v1960_v22 = vpop.permute.xlu1 %1959  ;;  %v3690_v33 = vpop.permute.xlu0 %1939 }
 0x326   : > { %v1826_v25 = vpop.permute.xlu1 %1825  ;;  %v1896_v13 = vpop.permute.xlu0 %1895 }
 0x327   : > { %v2047_v47 = vsel %vm1328_vm2, %v2031_v32, %v1896_v13  ;;  %v2002_v24 = vsel %vm874_vm4, %v3529_v36, %v1826_v25 }
 0x328   : > { %v2064_v45 = vsel %vm2060_vm0, %v2047_v47, %v1913_v57  ;;  %v2021_v1 = vsel %vm1276_vm15, %v2002_v24, %v3680_v5 }
 0x329   : > { %v2081_v7 = vsel %vm2077_vm1, %v2064_v45, %v3670_v52  ;;  %v2079_v52 = vsel %vm2077_vm1, %v2062_v14, %v1930_v20 }
 0x32a   : > { %v3700_v35 = vpop.permute.xlu1 %1879  ;;  %v1936_v42 = vpop.permute.xlu0 %1935  ;;  %v2098_v58 = vsel %vm2094_vm6, %v2081_v7, %v1958_v9 }
 0x32b   : > { %v2115_v59 = vsel %vm2111_vm7, %v2098_v58, %v3678_v55  ;;  %v2085_v9 = vsel %vm2077_vm1, %v2068_v18, %v1936_v42 }
 0x32e   : > { %v1822_v3 = vpop.permute.xlu1 %1821  ;;  %v1856_v51 = vpop.permute.xlu0 %1855 }
 0x32f   : > { %v1996_v43 = vsel %vm874_vm4, %v3560_v63, %v1822_v3 }
 0x330   : > { %v2017_v17 = vsel %vm1276_vm15, %v1996_v43, %v1846_v8 }
 0x331   : > { %v2033_v53 = vsel %vm1302_vm13, %v2017_v17, %v3668_v50 }
 0x332   : > { %v2049_v27 = vsel %vm1328_vm2, %v2033_v53, %v1898_v11  ;;  %v1956_v29 = vpop.permute.xlu1 %1955  ;;  %v1882_v23 = vpop.permute.xlu0 %1881 }
 0x333   : > { %v2066_v38 = vsel %vm2060_vm0, %v2049_v27, %v3674_v54  ;;  %v2096_v56 = vsel %vm2094_vm6, %v2079_v52, %v1956_v29 }
 0x334   : > { %v2113_v63 = vsel %vm2111_vm7, %v2096_v56, %v1973_v10  ;;  %v2083_v50 = vsel %vm2077_vm1, %v2066_v38, %v3676_v0 }
 0x335   : > { %v2562_v44 = vcombine.low %v2113_v63, %v2115_v59  ;;  %v2100_v60 = vsel %vm2094_vm6, %v2083_v50, %v1960_v22 }
 0x336   : > { %v1876_v40 = vpop.permute.xlu1 %1875  ;;  %v1979_v62 = vpop.permute.xlu0 %1978  ;;  %v2117_v20 = vsel %vm2111_vm7, %v2100_v60, %v1977_v30 }
 0x337   : > { %2630 = vmatprep.mubr.msk.bf16.mxu1 %vm2184_vm11, %v2562_v44  ;;  %v2037_v39 = vsel %vm1302_vm13, %v2021_v1, %v1876_v40 }
 0x33a   : > { %v1923_v54 = vpop.permute.xlu1 %1922  ;;  %v1852_v4 = vpop.permute.xlu0 %1851 }
 0x33e   : > { %v1942_v34 = vpop.permute.xlu1 %1941  ;;  %v1878_v57 = vpop.permute.xlu0 %1877 }
 0x342   : > { %v1919_v8 = vpop.permute.xlu1 %1918  ;;  %v1925_v31 = vpop.permute.xlu0 %1924 }
 0x346   : > { %v1938_v55 = vpop.permute.xlu1 %1937  ;;  %v1921_v28 = vpop.permute.xlu0 %1920 }
 0x34a   : > { %v1854_v41 = vpop.permute.xlu1 %1853  ;;  %v1832_v26 = vpop.permute.xlu0 %1831 }
 0x34b   : > { %v2011_v16 = vsel %vm874_vm4, %v3586_v48, %v1832_v26 }
 0x34c   : > { %v2027_v13 = vsel %vm1276_vm15, %v2011_v16, %v1856_v51 }
 0x34d   : > { %v2043_v36 = vsel %vm1302_vm13, %v2027_v13, %v1882_v23 }
 0x34e   : > { %v1981_v0 = vpop.permute.xlu1 %1980  ;;  %v1966_v10 = vpop.permute.xlu0 %1965 }
 0x352   : > { %v1906_v11 = vpop.permute.xlu1 %1905  ;;  %v1962_v12 = vpop.permute.xlu0 %1961 }
 0x353   : > { %v2102_v30 = vsel %vm2094_vm6, %v2085_v9, %v1962_v12 }
 0x354   : > { %v2119_v15 = vsel %vm2111_vm7, %v2102_v30, %v1979_v62 }
 0x355   : > { %v2563_v46 = vcombine.low %v2117_v20, %v2119_v15 }
 0x356   : > { %v1902_v19 = vpop.permute.xlu1 %1901  ;;  %v1828_v22 = vpop.permute.xlu0 %1827 }
 0x357   : > { %2631 = vmatmul.mubr.msk.bf16.vlgmr.msra.gmra.mrb[0].mxu1 %vm2184_vm11, %v2563_v46  ;;  %v2005_v18 = vsel %vm874_vm4, %v3594_v61, %v1828_v22  ;;  %v2053_v42 = vsel %vm1328_vm2, %v2037_v39, %v1902_v19 }
 0x358   : > { %v2023_v48 = vsel %vm1276_vm15, %v2005_v18, %v1852_v4  ;;  %v2070_v49 = vsel %vm2060_vm0, %v2053_v42, %v1919_v8 }
 0x359   : > { %v2039_v61 = vsel %vm1302_vm13, %v2023_v48, %v1878_v57  ;;  %v2087_v58 = vsel %vm2077_vm1, %v2070_v49, %v1938_v55 }
 0x35a   : > { %v1968_v32 = vpop.permute.xlu1 %1967  ;;  %v1908_v47 = vpop.permute.xlu0 %1907 }
 0x35b   : > { %v2059_v25 = vsel %vm1328_vm2, %v2043_v36, %v1908_v47 }
 0x35c   : > { %v2076_v3 = vsel %vm2060_vm0, %v2059_v25, %v1925_v31 }
 0x35e   : > { %v1830_v2 = vpop.permute.xlu1 %1829  ;;  %v1904_v45 = vpop.permute.xlu0 %1903 }
 0x35f   : > { %v2008_v5 = vsel %vm874_vm4, %v3619_v6, %v1830_v2  ;;  %v2055_v7 = vsel %vm1328_vm2, %v2039_v61, %v1904_v45 }
 0x360   : > { %v2025_v51 = vsel %vm1276_vm15, %v2008_v5, %v1854_v41  ;;  %v2072_v14 = vsel %vm2060_vm0, %v2055_v7, %v1921_v28  ;;  %vm2305_vm15 = vcmask 15360  }
 0x361   : > { %v2041_v43 = vsel %vm1302_vm13, %v2025_v51, %v3700_v35  ;;  %v2089_v17 = vsel %vm2077_vm1, %v2072_v14, %v3690_v33  ;;  %v2093_v35 = vsel %vm2077_vm1, %v2076_v3, %v3652_v37  ;;  %vm2314_vm13 = vcmask 48128  }
 0x362   : > { %v2057_v53 = vsel %vm1328_vm2, %v2041_v43, %v1906_v11  ;;  %v1964_v27 = vpop.permute.xlu1 %1963  ;;  %v2106_v6 = vsel %vm2094_vm6, %v2089_v17, %v1966_v10  ;;  %v1983_v52 = vpop.permute.xlu0 %1982  ;;  %v2110_v44 = vsel %vm2094_vm6, %v2093_v35, %v3660_v21 }
 0x363   : > { %v2104_v29 = vsel %vm2094_vm6, %v2087_v58, %v1964_v27  ;;  %v2123_v23 = vsel %vm2111_vm7, %v2106_v6, %v1983_v52  ;;  %v2074_v38 = vsel %vm2060_vm0, %v2057_v53, %v1923_v54 }
 0x364   : > { %v2121_v56 = vsel %vm2111_vm7, %v2104_v29, %v1981_v0  ;;  %v2091_v33 = vsel %vm2077_vm1, %v2074_v38, %v1942_v34 }
 0x365   : > { %v2564_v63 = vcombine.low %v2121_v56, %v2123_v23  ;;  %v2108_v59 = vsel %vm2094_vm6, %v2091_v33, %v1968_v32 }
 0x366   : > { %v1985_v50 = vpop.permute.xlu1 %1984  ;;  %v1987_v60 = vpop.permute.xlu0 %1986 }
 0x367   : > { %v2125_v40 = vsel %vm2111_vm7, %v2108_v59, %v1985_v50  ;;  %v2127_v62 = vsel %vm2111_vm7, %v2110_v44, %v1987_v60  ;;  %2634 = vmatprep.mubr.msk.bf16.mxu1 %vm2184_vm11, %v2564_v63 }
 0x368   : > { %v2565_v37 = vcombine.low %v2125_v40, %v2127_v62 }
 0x36a   : > { %2635 = vmatmul.mubr.msk.bf16.gmra.mrb[4].mxu1 %vm2184_vm11, %v2565_v37  ;;  %v2282_v20 = vpop.permute.xlu1 %2281  ;;  %v2284_v54 = vpop.permute.xlu0 %2283 }
 0x36b   : > { %v2306_v21 = vsel %vm2305_vm15, 0.0, %v2282_v20  ;;  %v2307_v31 = vsel %vm2305_vm15, 0.0, %v2284_v54 }
 0x36c   : > { %v2315_v28 = vsel %vm2314_vm13, %v2306_v21, 0.0  ;;  %v2316_v9 = vsel %vm2314_vm13, %v2307_v31, 0.0 }
 0x36e   : > { %v2286_v4 = vpop.permute.xlu1 %2285  ;;  %v2288_v34 = vpop.permute.xlu0 %2287 }
 0x36f   : > { %v2308_v57 = vsel %vm2305_vm15, 0.0, %v2286_v4  ;;  %v2309_v8 = vsel %vm2305_vm15, 0.0, %v2288_v34 }
 0x370   : > { %v2317_v55 = vsel %vm2314_vm13, %v2308_v57, 0.0  ;;  %v2318_v26 = vsel %vm2314_vm13, %v2309_v8, 0.0 }
 0x372   : > { %v2290_v16 = vpop.permute.xlu1 %2289  ;;  %v2292_v19 = vpop.permute.xlu0 %2291 }
 0x373   : > { %v2310_v1 = vsel %vm2305_vm15, 0.0, %v2290_v16  ;;  %v2311_v47 = vsel %vm2305_vm15, 0.0, %v2292_v19 }
 0x374   : > { %v2319_v25 = vsel %vm2314_vm13, %v2310_v1, 0.0  ;;  %v2320_v5 = vsel %vm2314_vm13, %v2311_v47, 0.0 }
 0x376   : > { %v2294_v22 = vpop.permute.xlu1 %2293  ;;  %v2296_v24 = vpop.permute.xlu0 %2295 }
 0x377   : > { %v2312_v18 = vsel %vm2305_vm15, 0.0, %v2294_v22  ;;  %v2313_v13 = vsel %vm2305_vm15, 0.0, %v2296_v24 }
 0x378   : > { %v2321_v32 = vsel %vm2314_vm13, %v2312_v18, 0.0  ;;  %v2322_v48 = vsel %vm2314_vm13, %v2313_v13, 0.0 }
 0x42a   : > { %v2632_v41 = vpop.f32.mrb[0].mxu1 }
 0x42b   : > { %v2325_v0 = vadd.f32 %v2632_v41, %v2317_v55  ;;  %v2234_v10 = vpop.f32.mrb[1].mxu1 }
 0x42c   : > { %v2323_v11 = vadd.f32 %v2315_v28, %v2234_v10  ;;  %v2633_v12 = vpop.f32.mrb[2].mxu1 }
 0x42d   : > { %2333 = vst.msk [vmem:[%s3785_s21 + $0x10] sm:$0xff] %vm874_vm4, %v2325_v0  ;;  %v2326_v30 = vadd.f32 %v2633_v12, %v2318_v26  ;;  %v2237_v15 = vpop.f32.mrb[3].mxu1 }
 0x42e   : > { %2331 = vst.msk [vmem:[%s3785_s21] sm:$0xff] %vm874_vm4, %v2323_v11  ;;  %v2324_v46 = vadd.f32 %v2316_v9, %v2237_v15 }
 0x42f   : > { %2334 = vst.msk [vmem:[%s3785_s21 + $0x18] sm:$0xff] %vm874_vm4, %v2326_v30 }
 0x430   : > { %2332 = vst.msk [vmem:[%s3785_s21 + $0x8] sm:$0xff] %vm874_vm4, %v2324_v46 }
 0x43d   : > { %v2636_v39 = vpop.f32.mrb[4].mxu1 }
 0x43e   : > { %v2329_v42 = vadd.f32 %v2636_v39, %v2321_v32  ;;  %v2250_v36 = vpop.f32.mrb[5].mxu1 }
 0x43f   : > { %v2327_v2 = vadd.f32 %v2319_v25, %v2250_v36  ;;  %v2637_v61 = vpop.f32.mrb[6].mxu1 }
 0x440   : > { %2337 = vst.msk [vmem:[%s3785_s21 + $0x30] sm:$0xff] %vm874_vm4, %v2329_v42  ;;  %v2330_v45 = vadd.f32 %v2637_v61, %v2322_v48  ;;  %v2253_v49 = vpop.f32.mrb[7].mxu1 }
 0x441   : > { %2335 = vst.msk [vmem:[%s3785_s21 + $0x20] sm:$0xff] %vm874_vm4, %v2327_v2  ;;  %v2328_v7 = vadd.f32 %v2320_v5, %v2253_v49 }
 0x442   : > { %2338 = vst.msk [vmem:[%s3785_s21 + $0x38] sm:$0xff] %vm874_vm4, %v2330_v45 }
 0x443   : > { %2336 = vst.msk [vmem:[%s3785_s21 + $0x28] sm:$0xff] %vm874_vm4, %v2328_v7 }
 0x444   : > { %2745 = shalt.err (!%p2742_p3)
}
 0x445   : > { %s2746_s9 = scalar_lea.hbm %s3810_s28, 1024  ;;  %s2750_s21 = scalar_lea.hbm %s3871_s7, 2048 }
 0x446   : > { %p2747_p4 = scmp.ne.s32.totalorder %s3810_s28, %s2746_s9  ;;  %p2751_p9 = scmp.lt.u32.totalorder %s3810_s28, %s3871_s7 }
 0x447   : > { %p2752_p10 = scmp.lt.u32.totalorder %s2750_s21, %s2746_s9  ;;  %p2754_p12 = scmp.lt.u32.totalorder %s2746_s9, %s3810_s28 }
 0x448   : > { %p2748_p7 = pnand %p2747_p4, %p2888_p5 }
 0x449   : > { %p2753_p11 = por %p2752_p10, %p2751_p9 }
 0x44a   : > { %p2749_p8 = pneg %p2748_p7 }
 0x44b   : > { %p2755_p13 = por %p2754_p12, %p2753_p11 }
 0x44d   : > { %p2756_p0 = pnand %p2755_p13, %p2749_p8 }
 0x44f   : > { %2759 = shalt.err (!%p2756_p0)
}
 0x450   : > { %s2809_s14 = smov 128  }
 0x451   : > { %2640 = dma.vmem_to_hbm [thread:$0]  (%p2888_p5), %s3814_s16, 1024, %s3810_s28, %s3822_s15, %s2809_s14, %s2809_s14, %s2799_s29  }
 0x452 PF: > { %p2646_p1 = scmp.ge.s32.totalorder %s2794_s27, 2  ;;  %s2368_s17 = sand.u32 1, %s2782_s24  }
 0x453   : > { %s2369_s18 = scalar_lea.sflag [#allocation6], %s2368_s17 }
 0x454   : > { %p2643_p2 = pnand %p2646_p1, %p2892_p6 }
 0x456   : > { %2777 = dma.done.wait (!%p2643_p2), %s2369_s18, 1024  }
 0x457   : > { %2779 = vsyncadd (!%p2643_p2), %s2369_s18, 4294966272  ;;  %p17_p3 = scmp.ge.s32.totalorder %s2875_s30, 4   ;;  %s3880_s24 = smov %s2786_s25 }
 0x458   : > { %s3881_s25 = smov %s2790_s26  ;;  %s3882_s26 = smov %s2886_s10 }
 0x459   : > { %s3883_s27 = smov %s2875_s30  ;;  %19 = sbr.rel (!%p17_p3) target bundleno = 3 (0x3), region = 116 }
 0x460   :  { %2374 = vsyncpa [#allocation6], 1 }
 0x461   :  { %2376 = vsyncpa [#allocation6 + $0x1], 1 }

</bundles_post_ra>
